<compile_context>
chip_gen: v6e
topology: v6e:2x2x1
jax: 0.10.0
libtpu: 0.0.40
codegen_flags: <defaults>
</compile_context>

<pallas_src>
import functools

import jax
import jax.numpy as jnp
from jax.experimental import pallas as pl
from jax.experimental.pallas import tpu as pltpu

LEAKY_SLOPE = 0.1   # nn.LeakyReLU(0.1)
LN_EPS = 1e-5

H1, H2, H3 = 512, 512, 256


def _leaky_relu(x):
    return jnp.where(x > 0, x, LEAKY_SLOPE * x)


def _layer_norm(x, gamma, beta):
    # Single-pass variance: E[x^2] - mean^2 (one fewer cross-lane reduction).
    mean = jnp.mean(x, axis=-1, keepdims=True)
    mean_sq = jnp.mean(x * x, axis=-1, keepdims=True)
    var = mean_sq - mean * mean
    inv = jax.lax.rsqrt(var + LN_EPS)
    return (x - mean) * inv * gamma + beta


def neural_lm3_kernel(x_ref, w1_ref, b1_ref, w2_ref, b2_ref, w3_ref, b3_ref,
                      w4_ref, b4_ref, g1_ref, be1_ref, g2_ref, be2_ref,
                      out_ref, h3_ref):
    # fc1 .. fc3 depend only on the batch tile -> compute once per batch tile
    # (grid axis 2 = vocab is innermost) and cache in bf16 VMEM scratch.
    @pl.when(pl.program_id(2) == 0)
    def _trunk():
        x = x_ref[...]                                                 # bf16 (TM, Kp)

        # identity = fc1(x)  (f32 accumulate on the MXU)
        identity = jnp.dot(x, w1_ref[...],
                           preferred_element_type=jnp.float32) + b1_ref[...]

        # x = dropout(layer_norm1(leaky_relu(fc1(x))))
        # TODO(synk): nn.Dropout(0.4) is identity at inference; training-mode RNG mask not implemented.
        h = _layer_norm(_leaky_relu(identity), g1_ref[...], be1_ref[...])

        # x = dropout(layer_norm2(leaky_relu(fc2(x))))
        h = jnp.dot(h.astype(jnp.bfloat16), w2_ref[...],
                    preferred_element_type=jnp.float32) + b2_ref[...]
        h = _layer_norm(_leaky_relu(h), g2_ref[...], be2_ref[...])

        # residual connection (raw fc1 pre-activation, as in the reference forward)
        h = h + identity

        # x = dropout(leaky_relu(fc3(x)))
        h = jnp.dot(h.astype(jnp.bfloat16), w3_ref[...],
                    preferred_element_type=jnp.float32) + b3_ref[...]
        h3_ref[...] = _leaky_relu(h).astype(jnp.bfloat16)              # (TM, 256) bf16

    # x = fc4(x)  -- one vocab tile per inner grid step
    out = jnp.dot(h3_ref[...], w4_ref[...],
                  preferred_element_type=jnp.float32) + b4_ref[...]
    out_ref[...] = out.astype(out_ref.dtype)


# ----------------------------------------------------------------------------
# Parameters
# ----------------------------------------------------------------------------

def init_params(key, vocab_size, context_size, embedding_dim):
    """Deterministic PyTorch-style (uniform +-1/sqrt(fan_in)) initialization."""
    ks = jax.random.split(key, 10)
    in_dim = context_size * embedding_dim

    def linear(kw, kb, fan_in, fan_out):
        bound = 1.0 / jnp.sqrt(fan_in)
        w = jax.random.uniform(kw, (fan_in, fan_out), jnp.float32, -bound, bound)
        b = jax.random.uniform(kb, (1, fan_out), jnp.float32, -bound, bound)
        return w, b

    params = {}
    params["embedding"] = jax.random.normal(ks[0], (vocab_size, embedding_dim),
                                            jnp.float32)
    params["w1"], params["b1"] = linear(ks[1], ks[2], in_dim, H1)
    params["w2"], params["b2"] = linear(ks[3], ks[4], H1, H2)
    params["w3"], params["b3"] = linear(ks[5], ks[6], H2, H3)
    params["w4"], params["b4"] = linear(ks[7], ks[8], H3, vocab_size)
    params["ln1_g"] = jnp.ones((1, H1), jnp.float32)
    params["ln1_b"] = jnp.zeros((1, H1), jnp.float32)
    params["ln2_g"] = jnp.ones((1, H2), jnp.float32)
    params["ln2_b"] = jnp.zeros((1, H2), jnp.float32)
    return params


def _round_up(x, m):
    return (x + m - 1) // m * m


def _device_kind():
    try:
        return jax.devices()[0].device_kind.lower()
    except Exception:
        return ""


def _default_tm_cap():
    # v5e: raise the batch-tile cap so the big (H3 x V) fc4 weight is
    # re-streamed fewer times (lowest HBM BW generation).  v6e/v7x: 256 rows
    # matches the 2x256^2 MXU.
    if "v5" in _device_kind():
        return 512
    return 256


def _num_tensorcores():
    # v7x has 2 TensorCores per chip; v5e/v6e have 1.
    return 2 if "v7" in _device_kind() else 1


def prepare_params(params, *, tn_cap=2048):
    """One-time weight preprocessing (pads + bf16 casts), hoisted out of forward."""
    K = params["w1"].shape[0]
    V = params["w4"].shape[1]
    K_pad = _round_up(K, 128)                       # e.g. 96 -> 128
    TN = min(tn_cap, _round_up(V, 128))             # lane-dense vocab tile
    V_pad = _round_up(V, TN)

    prep = {
        "embedding": params["embedding"].astype(jnp.bfloat16),
        "w1": jnp.pad(params["w1"], ((0, K_pad - K), (0, 0))).astype(jnp.bfloat16),
        "b1": params["b1"],
        "w2": params["w2"].astype(jnp.bfloat16),
        "b2": params["b2"],
        "w3": params["w3"].astype(jnp.bfloat16),
        "b3": params["b3"],
        "w4": jnp.pad(params["w4"], ((0, 0), (0, V_pad - V))).astype(jnp.bfloat16),
        "b4": jnp.pad(params["b4"], ((0, 0), (0, V_pad - V))),
        "ln1_g": params["ln1_g"], "ln1_b": params["ln1_b"],
        "ln2_g": params["ln2_g"], "ln2_b": params["ln2_b"],
    }
    meta = {"K": K, "K_pad": K_pad, "V": V, "V_pad": V_pad, "TN": TN}
    return prep, meta


# ----------------------------------------------------------------------------
# Forward
# ----------------------------------------------------------------------------

def neural_lm3_forward(tokens, prep, meta, *, tm=None, out_dtype=jnp.float32):
    K, K_pad = meta["K"], meta["K_pad"]
    V, V_pad, TN = meta["V"], meta["V_pad"], meta["TN"]

    # ---- Embedding lookup + flatten (plain-JAX glue, bf16 table) ----
    B = tokens.shape[0]
    x = jnp.take(prep["embedding"], tokens, axis=0).reshape(B, -1)   # (B, K) bf16

    # ---- Tiling: batch tile matched to the real batch (>=16 for bf16 packing) ----
    TM = tm if tm is not None else min(_default_tm_cap(), max(16, _round_up(B, 16)))
    B_pad = _round_up(B, TM)
    x_p = jnp.pad(x, ((0, B_pad - B), (0, K_pad - K)))               # zero rows/cols

    b_tiles = B_pad // TM
    v_tiles = V_pad // TN

    # v7x: with a single batch tile, split the vocab tiles across the two
    # TensorCores via a leading "parallel" axis (each core redoes the cheap trunk).
    n_split = 2 if (_num_tensorcores() == 2 and b_tiles == 1
                    and v_tiles % 2 == 0) else 1
    vps = v_tiles // n_split                                         # vocab tiles / split

    grid = (n_split, b_tiles, vps)

    def const(shape):
        # weights / biases / LN params: same block every step -> VMEM-resident
        return pl.BlockSpec(shape, lambda c, i, j: (0, 0))

    in_specs = [
        pl.BlockSpec((TM, K_pad), lambda c, i, j: (i, 0)),            # x (batch tile)
        const((K_pad, H1)), const((1, H1)),                           # w1, b1
        const((H1, H2)),    const((1, H2)),                           # w2, b2
        const((H2, H3)),    const((1, H3)),                           # w3, b3
        pl.BlockSpec((H3, TN), lambda c, i, j: (0, c * vps + j)),     # w4 (vocab tile)
        pl.BlockSpec((1, TN),  lambda c, i, j: (0, c * vps + j)),     # b4
        const((1, H1)), const((1, H1)),                               # ln1 gamma/beta
        const((1, H2)), const((1, H2)),                               # ln2 gamma/beta
    ]
    out_spec = pl.BlockSpec((TM, TN), lambda c, i, j: (i, c * vps + j))

    out_padded = pl.pallas_call(
        neural_lm3_kernel,
        out_shape=jax.ShapeDtypeStruct((B_pad, V_pad), out_dtype),
        grid_spec=pltpu.PrefetchScalarGridSpec(
            num_scalar_prefetch=0,
            grid=grid,
            in_specs=in_specs,
            out_specs=out_spec,
            scratch_shapes=[pltpu.VMEM((TM, H3), jnp.bfloat16)],      # cached fc3 out
        ),
        compiler_params=pltpu.CompilerParams(
            dimension_semantics=("parallel", "parallel", "arbitrary"),
            vmem_limit_bytes=32 * 1024 * 1024,                        # real need ~few MB
        ),
    )(x_p,
      prep["w1"], prep["b1"],
      prep["w2"], prep["b2"],
      prep["w3"], prep["b3"],
      prep["w4"], prep["b4"],
      prep["ln1_g"], prep["ln1_b"],
      prep["ln2_g"], prep["ln2_b"])

    return out_padded[:B, :V]


if __name__ == "__main__":
    # Small, module-consistent shapes
    context_size = 3
    embedding_dim = 32
    vocab_size = 256
    batch = 8

    key = jax.random.PRNGKey(0)
    k_params, k_tokens = jax.random.split(key)

    params = init_params(k_params, vocab_size, context_size, embedding_dim)
    tokens = jax.random.randint(k_tokens, (batch, context_size), 0, vocab_size,
                                dtype=jnp.int32)

    # One-time weight prep, jitted forward (meta stays a Python-level constant).
    prep, meta = prepare_params(params)
    fwd = jax.jit(functools.partial(neural_lm3_forward, meta=meta))

    logits = fwd(tokens, prep)
    jax.block_until_ready(logits)
    assert logits.shape == (batch, vocab_size)
    print("KERNEL_OK")
</pallas_src>

<mosaic_0001>
module attributes {stable_mosaic.version = 11 : i64} {
  func.func @neural_lm3_kernel(%arg0: i32, %arg1: i32, %arg2: i32, %arg3: memref<16x128xbf16, #tpu.memory_space<vmem>>, %arg4: memref<128x512xbf16, #tpu.memory_space<vmem>>, %arg5: memref<1x512xf32, #tpu.memory_space<vmem>>, %arg6: memref<512x512xbf16, #tpu.memory_space<vmem>>, %arg7: memref<1x512xf32, #tpu.memory_space<vmem>>, %arg8: memref<512x256xbf16, #tpu.memory_space<vmem>>, %arg9: memref<1x256xf32, #tpu.memory_space<vmem>>, %arg10: memref<256x256xbf16, #tpu.memory_space<vmem>>, %arg11: memref<1x256xf32, #tpu.memory_space<vmem>>, %arg12: memref<1x512xf32, #tpu.memory_space<vmem>>, %arg13: memref<1x512xf32, #tpu.memory_space<vmem>>, %arg14: memref<1x512xf32, #tpu.memory_space<vmem>>, %arg15: memref<1x512xf32, #tpu.memory_space<vmem>>, %arg16: memref<16x256xf32, #tpu.memory_space<vmem>>, %arg17: memref<16x256xbf16, #tpu.memory_space<vmem>>) attributes {dimension_semantics = [#tpu.dimension_semantics<parallel>, #tpu.dimension_semantics<parallel>, #tpu.dimension_semantics<arbitrary>], iteration_bounds = array<i64: 1, 1, 1>, scalar_prefetch = 0 : i64, scratch_operands = 1 : i64, tpu.core_type = #tpu.core_type<tc>, window_params = [{transform_indices = @transform_0, window_bounds = array<i64: 16, 128>}, {pipeline_mode = #tpu.pipeline_mode<synchronous>, transform_indices = @transform_1, window_bounds = array<i64: 128, 512>}, {pipeline_mode = #tpu.pipeline_mode<synchronous>, transform_indices = @transform_2, window_bounds = array<i64: 1, 512>}, {pipeline_mode = #tpu.pipeline_mode<synchronous>, transform_indices = @transform_3, window_bounds = array<i64: 512, 512>}, {pipeline_mode = #tpu.pipeline_mode<synchronous>, transform_indices = @transform_4, window_bounds = array<i64: 1, 512>}, {pipeline_mode = #tpu.pipeline_mode<synchronous>, transform_indices = @transform_5, window_bounds = array<i64: 512, 256>}, {pipeline_mode = #tpu.pipeline_mode<synchronous>, transform_indices = @transform_6, window_bounds = array<i64: 1, 256>}, {transform_indices = @transform_7, window_bounds = array<i64: 256, 256>}, {transform_indices = @transform_8, window_bounds = array<i64: 1, 256>}, {pipeline_mode = #tpu.pipeline_mode<synchronous>, transform_indices = @transform_9, window_bounds = array<i64: 1, 512>}, {pipeline_mode = #tpu.pipeline_mode<synchronous>, transform_indices = @transform_10, window_bounds = array<i64: 1, 512>}, {pipeline_mode = #tpu.pipeline_mode<synchronous>, transform_indices = @transform_11, window_bounds = array<i64: 1, 512>}, {pipeline_mode = #tpu.pipeline_mode<synchronous>, transform_indices = @transform_12, window_bounds = array<i64: 1, 512>}, {transform_indices = @transform_13, window_bounds = array<i64: 16, 256>}]} {
    %c0_i32 = arith.constant 0 : i32
    %0 = arith.cmpi eq, %arg2, %c0_i32 : i32
    %1 = arith.extui %0 : i1 to i32
    %c0_i32_0 = arith.constant 0 : i32
    %2 = arith.cmpi ne, %1, %c0_i32_0 : i32
    scf.if %2 {
      %c0_8 = arith.constant 0 : index
      %c0_9 = arith.constant 0 : index
      %10 = vector.load %arg3[%c0_8, %c0_9] : memref<16x128xbf16, #tpu.memory_space<vmem>>, vector<16x128xbf16>
      %c0_10 = arith.constant 0 : index
      %c0_11 = arith.constant 0 : index
      %11 = vector.load %arg4[%c0_10, %c0_11] : memref<128x512xbf16, #tpu.memory_space<vmem>>, vector<128x512xbf16>
      %cst_12 = arith.constant dense<0.000000e+00> : vector<16x512xf32>
      %12 = tpu.matmul %10, %11, %cst_12 {dimension_numbers = #tpu.dot_dimension_numbers<[1], [0], [0], [1], [0, 0, 1, 1], [], []>} : vector<16x128xbf16>, vector<128x512xbf16>, vector<16x512xf32> -> vector<16x512xf32>
      %c0_13 = arith.constant 0 : index
      %c0_14 = arith.constant 0 : index
      %13 = vector.load %arg5[%c0_13, %c0_14] : memref<1x512xf32, #tpu.memory_space<vmem>>, vector<1x512xf32>
      %14 = vector.broadcast %13 : vector<1x512xf32> to vector<16x512xf32>
      %15 = arith.addf %12, %14 : vector<16x512xf32>
      %cst_15 = arith.constant 0.000000e+00 : f32
      %16 = vector.broadcast %cst_15 : f32 to vector<16x512xf32>
      %17 = arith.cmpf ogt, %15, %16 : vector<16x512xf32>
      %cst_16 = arith.constant 1.000000e-01 : f32
      %18 = vector.broadcast %cst_16 : f32 to vector<16x512xf32>
      %19 = arith.mulf %18, %15 : vector<16x512xf32>
      %20 = arith.select %17, %15, %19 : vector<16x512xi1>, vector<16x512xf32>
      %c0_17 = arith.constant 0 : index
      %c0_18 = arith.constant 0 : index
      %21 = vector.load %arg12[%c0_17, %c0_18] : memref<1x512xf32, #tpu.memory_space<vmem>>, vector<1x512xf32>
      %c0_19 = arith.constant 0 : index
      %c0_20 = arith.constant 0 : index
      %22 = vector.load %arg13[%c0_19, %c0_20] : memref<1x512xf32, #tpu.memory_space<vmem>>, vector<1x512xf32>
      %cst_21 = arith.constant dense<0.000000e+00> : vector<16xf32>
      %23 = vector.multi_reduction <add>, %20, %cst_21 [1] : vector<16x512xf32> to vector<16xf32>
      %24 = vector.shape_cast %23 : vector<16xf32> to vector<16x1xf32>
      %cst_22 = arith.constant 5.120000e+02 : f32
      %25 = vector.broadcast %cst_22 : f32 to vector<16x1xf32>
      %26 = arith.divf %24, %25 : vector<16x1xf32>
      %27 = arith.mulf %20, %20 : vector<16x512xf32>
      %cst_23 = arith.constant dense<0.000000e+00> : vector<16xf32>
      %28 = vector.multi_reduction <add>, %27, %cst_23 [1] : vector<16x512xf32> to vector<16xf32>
      %29 = vector.shape_cast %28 : vector<16xf32> to vector<16x1xf32>
      %cst_24 = arith.constant 5.120000e+02 : f32
      %30 = vector.broadcast %cst_24 : f32 to vector<16x1xf32>
      %31 = arith.divf %29, %30 : vector<16x1xf32>
      %32 = arith.mulf %26, %26 : vector<16x1xf32>
      %33 = arith.subf %31, %32 : vector<16x1xf32>
      %cst_25 = arith.constant 9.99999974E-6 : f32
      %34 = vector.broadcast %cst_25 : f32 to vector<16x1xf32>
      %35 = arith.addf %33, %34 : vector<16x1xf32>
      %36 = math.rsqrt %35 : vector<16x1xf32>
      %37 = vector.broadcast %26 : vector<16x1xf32> to vector<16x512xf32>
      %38 = arith.subf %20, %37 : vector<16x512xf32>
      %39 = vector.broadcast %36 : vector<16x1xf32> to vector<16x512xf32>
      %40 = arith.mulf %38, %39 : vector<16x512xf32>
      %41 = vector.broadcast %21 : vector<1x512xf32> to vector<16x512xf32>
      %42 = arith.mulf %40, %41 : vector<16x512xf32>
      %43 = vector.broadcast %22 : vector<1x512xf32> to vector<16x512xf32>
      %44 = arith.addf %42, %43 : vector<16x512xf32>
      %45 = arith.truncf %44 : vector<16x512xf32> to vector<16x512xbf16>
      %c0_26 = arith.constant 0 : index
      %c0_27 = arith.constant 0 : index
      %46 = vector.load %arg6[%c0_26, %c0_27] : memref<512x512xbf16, #tpu.memory_space<vmem>>, vector<512x512xbf16>
      %cst_28 = arith.constant dense<0.000000e+00> : vector<16x512xf32>
      %47 = tpu.matmul %45, %46, %cst_28 {dimension_numbers = #tpu.dot_dimension_numbers<[1], [0], [0], [1], [0, 0, 1, 1], [], []>} : vector<16x512xbf16>, vector<512x512xbf16>, vector<16x512xf32> -> vector<16x512xf32>
      %c0_29 = arith.constant 0 : index
      %c0_30 = arith.constant 0 : index
      %48 = vector.load %arg7[%c0_29, %c0_30] : memref<1x512xf32, #tpu.memory_space<vmem>>, vector<1x512xf32>
      %49 = vector.broadcast %48 : vector<1x512xf32> to vector<16x512xf32>
      %50 = arith.addf %47, %49 : vector<16x512xf32>
      %cst_31 = arith.constant 0.000000e+00 : f32
      %51 = vector.broadcast %cst_31 : f32 to vector<16x512xf32>
      %52 = arith.cmpf ogt, %50, %51 : vector<16x512xf32>
      %cst_32 = arith.constant 1.000000e-01 : f32
      %53 = vector.broadcast %cst_32 : f32 to vector<16x512xf32>
      %54 = arith.mulf %53, %50 : vector<16x512xf32>
      %55 = arith.select %52, %50, %54 : vector<16x512xi1>, vector<16x512xf32>
      %c0_33 = arith.constant 0 : index
      %c0_34 = arith.constant 0 : index
      %56 = vector.load %arg14[%c0_33, %c0_34] : memref<1x512xf32, #tpu.memory_space<vmem>>, vector<1x512xf32>
      %c0_35 = arith.constant 0 : index
      %c0_36 = arith.constant 0 : index
      %57 = vector.load %arg15[%c0_35, %c0_36] : memref<1x512xf32, #tpu.memory_space<vmem>>, vector<1x512xf32>
      %cst_37 = arith.constant dense<0.000000e+00> : vector<16xf32>
      %58 = vector.multi_reduction <add>, %55, %cst_37 [1] : vector<16x512xf32> to vector<16xf32>
      %59 = vector.shape_cast %58 : vector<16xf32> to vector<16x1xf32>
      %cst_38 = arith.constant 5.120000e+02 : f32
      %60 = vector.broadcast %cst_38 : f32 to vector<16x1xf32>
      %61 = arith.divf %59, %60 : vector<16x1xf32>
      %62 = arith.mulf %55, %55 : vector<16x512xf32>
      %cst_39 = arith.constant dense<0.000000e+00> : vector<16xf32>
      %63 = vector.multi_reduction <add>, %62, %cst_39 [1] : vector<16x512xf32> to vector<16xf32>
      %64 = vector.shape_cast %63 : vector<16xf32> to vector<16x1xf32>
      %cst_40 = arith.constant 5.120000e+02 : f32
      %65 = vector.broadcast %cst_40 : f32 to vector<16x1xf32>
      %66 = arith.divf %64, %65 : vector<16x1xf32>
      %67 = arith.mulf %61, %61 : vector<16x1xf32>
      %68 = arith.subf %66, %67 : vector<16x1xf32>
      %cst_41 = arith.constant 9.99999974E-6 : f32
      %69 = vector.broadcast %cst_41 : f32 to vector<16x1xf32>
      %70 = arith.addf %68, %69 : vector<16x1xf32>
      %71 = math.rsqrt %70 : vector<16x1xf32>
      %72 = vector.broadcast %61 : vector<16x1xf32> to vector<16x512xf32>
      %73 = arith.subf %55, %72 : vector<16x512xf32>
      %74 = vector.broadcast %71 : vector<16x1xf32> to vector<16x512xf32>
      %75 = arith.mulf %73, %74 : vector<16x512xf32>
      %76 = vector.broadcast %56 : vector<1x512xf32> to vector<16x512xf32>
      %77 = arith.mulf %75, %76 : vector<16x512xf32>
      %78 = vector.broadcast %57 : vector<1x512xf32> to vector<16x512xf32>
      %79 = arith.addf %77, %78 : vector<16x512xf32>
      %80 = arith.addf %79, %15 : vector<16x512xf32>
      %81 = arith.truncf %80 : vector<16x512xf32> to vector<16x512xbf16>
      %c0_42 = arith.constant 0 : index
      %c0_43 = arith.constant 0 : index
      %82 = vector.load %arg8[%c0_42, %c0_43] : memref<512x256xbf16, #tpu.memory_space<vmem>>, vector<512x256xbf16>
      %cst_44 = arith.constant dense<0.000000e+00> : vector<16x256xf32>
      %83 = tpu.matmul %81, %82, %cst_44 {dimension_numbers = #tpu.dot_dimension_numbers<[1], [0], [0], [1], [0, 0, 1, 1], [], []>} : vector<16x512xbf16>, vector<512x256xbf16>, vector<16x256xf32> -> vector<16x256xf32>
      %c0_45 = arith.constant 0 : index
      %c0_46 = arith.constant 0 : index
      %84 = vector.load %arg9[%c0_45, %c0_46] : memref<1x256xf32, #tpu.memory_space<vmem>>, vector<1x256xf32>
      %85 = vector.broadcast %84 : vector<1x256xf32> to vector<16x256xf32>
      %86 = arith.addf %83, %85 : vector<16x256xf32>
      %cst_47 = arith.constant 0.000000e+00 : f32
      %87 = vector.broadcast %cst_47 : f32 to vector<16x256xf32>
      %88 = arith.cmpf ogt, %86, %87 : vector<16x256xf32>
      %cst_48 = arith.constant 1.000000e-01 : f32
      %89 = vector.broadcast %cst_48 : f32 to vector<16x256xf32>
      %90 = arith.mulf %89, %86 : vector<16x256xf32>
      %91 = arith.select %88, %86, %90 : vector<16x256xi1>, vector<16x256xf32>
      %92 = arith.truncf %91 : vector<16x256xf32> to vector<16x256xbf16>
      %c0_49 = arith.constant 0 : index
      %c0_50 = arith.constant 0 : index
      %93 = vector.load %arg17[%c0_49, %c0_50] : memref<16x256xbf16, #tpu.memory_space<vmem>>, vector<16x256xbf16>
      tpu.vector_store %arg17[%c0_49, %c0_50], %92 {strides = array<i32>} : memref<16x256xbf16, #tpu.memory_space<vmem>>, vector<16x256xbf16>,
    } else {
    }
    %c0 = arith.constant 0 : index
    %c0_1 = arith.constant 0 : index
    %3 = vector.load %arg17[%c0, %c0_1] : memref<16x256xbf16, #tpu.memory_space<vmem>>, vector<16x256xbf16>
    %c0_2 = arith.constant 0 : index
    %c0_3 = arith.constant 0 : index
    %4 = vector.load %arg10[%c0_2, %c0_3] : memref<256x256xbf16, #tpu.memory_space<vmem>>, vector<256x256xbf16>
    %cst = arith.constant dense<0.000000e+00> : vector<16x256xf32>
    %5 = tpu.matmul %3, %4, %cst {dimension_numbers = #tpu.dot_dimension_numbers<[1], [0], [0], [1], [0, 0, 1, 1], [], []>} : vector<16x256xbf16>, vector<256x256xbf16>, vector<16x256xf32> -> vector<16x256xf32>
    %c0_4 = arith.constant 0 : index
    %c0_5 = arith.constant 0 : index
    %6 = vector.load %arg11[%c0_4, %c0_5] : memref<1x256xf32, #tpu.memory_space<vmem>>, vector<1x256xf32>
    %7 = vector.broadcast %6 : vector<1x256xf32> to vector<16x256xf32>
    %8 = arith.addf %5, %7 : vector<16x256xf32>
    %c0_6 = arith.constant 0 : index
    %c0_7 = arith.constant 0 : index
    %9 = vector.load %arg16[%c0_6, %c0_7] : memref<16x256xf32, #tpu.memory_space<vmem>>, vector<16x256xf32>
    tpu.vector_store %arg16[%c0_6, %c0_7], %8 {strides = array<i32>} : memref<16x256xf32, #tpu.memory_space<vmem>>, vector<16x256xf32>,
    return
  }
  func.func @transform_0(%arg0: i32, %arg1: i32, %arg2: i32) -> (i32, i32) {
    %c0_i32 = arith.constant 0 : i32
    %c0_i32_0 = arith.constant 0 : i32
    return %arg1, %c0_i32 : i32, i32
  }
  func.func @transform_1(%arg0: i32, %arg1: i32, %arg2: i32) -> (i32, i32) {
    %c0_i32 = arith.constant 0 : i32
    %c0_i32_0 = arith.constant 0 : i32
    %c0_i32_1 = arith.constant 0 : i32
    return %c0_i32, %c0_i32_0 : i32, i32
  }
  func.func @transform_2(%arg0: i32, %arg1: i32, %arg2: i32) -> (i32, i32) {
    %c0_i32 = arith.constant 0 : i32
    %c0_i32_0 = arith.constant 0 : i32
    %c0_i32_1 = arith.constant 0 : i32
    return %c0_i32, %c0_i32_0 : i32, i32
  }
  func.func @transform_3(%arg0: i32, %arg1: i32, %arg2: i32) -> (i32, i32) {
    %c0_i32 = arith.constant 0 : i32
    %c0_i32_0 = arith.constant 0 : i32
    %c0_i32_1 = arith.constant 0 : i32
    return %c0_i32, %c0_i32_0 : i32, i32
  }
  func.func @transform_4(%arg0: i32, %arg1: i32, %arg2: i32) -> (i32, i32) {
    %c0_i32 = arith.constant 0 : i32
    %c0_i32_0 = arith.constant 0 : i32
    %c0_i32_1 = arith.constant 0 : i32
    return %c0_i32, %c0_i32_0 : i32, i32
  }
  func.func @transform_5(%arg0: i32, %arg1: i32, %arg2: i32) -> (i32, i32) {
    %c0_i32 = arith.constant 0 : i32
    %c0_i32_0 = arith.constant 0 : i32
    %c0_i32_1 = arith.constant 0 : i32
    return %c0_i32, %c0_i32_0 : i32, i32
  }
  func.func @transform_6(%arg0: i32, %arg1: i32, %arg2: i32) -> (i32, i32) {
    %c0_i32 = arith.constant 0 : i32
    %c0_i32_0 = arith.constant 0 : i32
    %c0_i32_1 = arith.constant 0 : i32
    return %c0_i32, %c0_i32_0 : i32, i32
  }
  func.func @transform_7(%arg0: i32, %arg1: i32, %arg2: i32) -> (i32, i32) {
    %c1_i32 = arith.constant 1 : i32
    %0 = arith.muli %arg0, %c1_i32 : i32
    %1 = arith.addi %0, %arg2 : i32
    %c0_i32 = arith.constant 0 : i32
    %c0_i32_0 = arith.constant 0 : i32
    return %c0_i32, %1 : i32, i32
  }
  func.func @transform_8(%arg0: i32, %arg1: i32, %arg2: i32) -> (i32, i32) {
    %c1_i32 = arith.constant 1 : i32
    %0 = arith.muli %arg0, %c1_i32 : i32
    %1 = arith.addi %0, %arg2 : i32
    %c0_i32 = arith.constant 0 : i32
    %c0_i32_0 = arith.constant 0 : i32
    return %c0_i32, %1 : i32, i32
  }
  func.func @transform_9(%arg0: i32, %arg1: i32, %arg2: i32) -> (i32, i32) {
    %c0_i32 = arith.constant 0 : i32
    %c0_i32_0 = arith.constant 0 : i32
    %c0_i32_1 = arith.constant 0 : i32
    return %c0_i32, %c0_i32_0 : i32, i32
  }
  func.func @transform_10(%arg0: i32, %arg1: i32, %arg2: i32) -> (i32, i32) {
    %c0_i32 = arith.constant 0 : i32
    %c0_i32_0 = arith.constant 0 : i32
    %c0_i32_1 = arith.constant 0 : i32
    return %c0_i32, %c0_i32_0 : i32, i32
  }
  func.func @transform_11(%arg0: i32, %arg1: i32, %arg2: i32) -> (i32, i32) {
    %c0_i32 = arith.constant 0 : i32
    %c0_i32_0 = arith.constant 0 : i32
    %c0_i32_1 = arith.constant 0 : i32
    return %c0_i32, %c0_i32_0 : i32, i32
  }
  func.func @transform_12(%arg0: i32, %arg1: i32, %arg2: i32) -> (i32, i32) {
    %c0_i32 = arith.constant 0 : i32
    %c0_i32_0 = arith.constant 0 : i32
    %c0_i32_1 = arith.constant 0 : i32
    return %c0_i32, %c0_i32_0 : i32, i32
  }
  func.func @transform_13(%arg0: i32, %arg1: i32, %arg2: i32) -> (i32, i32) {
    %c1_i32 = arith.constant 1 : i32
    %0 = arith.muli %arg0, %c1_i32 : i32
    %1 = arith.addi %0, %arg2 : i32
    %c0_i32 = arith.constant 0 : i32
    return %arg1, %1 : i32, i32
  }
}

</mosaic_0001>

<bundles_post_ra>
// kernel: neural_lm3_forward.1
= control target key start
LH: loop header
LB: loop body
LE: loop exit
PB: predicated region body
PF: predicated region fallthrough
CT: control target
= control target key end

     0   :  { %18 = vsyncpa [#allocation4], 0  ;;  %s3638_s0 = inlined_call_operand.vmem [shape: bf16[16,128], index: 0, kind: input, shape index: {}]   ;;  %s3639_s1 = inlined_call_operand.vmem [shape: bf16[128,512], index: 1, kind: input, shape index: {}]   ;;  %s3640_s2 = inlined_call_operand.vmem [shape: f32[1,512], index: 2, kind: input, shape index: {}]   ;;  %s3641_s3 = inlined_call_operand.hbm [shape: bf16[512,512], index: 3, kind: input, shape index: {}]   ;;  %s3642_s4 = inlined_call_operand.vmem [shape: f32[1,512], index: 4, kind: input, shape index: {}]   ;;  %s3643_s5 = inlined_call_operand.hbm [shape: bf16[512,256], index: 5, kind: input, shape index: {}]   ;;  %s3644_s6 = inlined_call_operand.vmem [shape: f32[1,256], index: 6, kind: input, shape index: {}]   ;;  %s3645_s7 = inlined_call_operand.hbm [shape: bf16[256,256], index: 7, kind: input, shape index: {}]   ;;  %s3646_s8 = inlined_call_operand.vmem [shape: f32[1,256], index: 8, kind: input, shape index: {}]   ;;  %s3647_s9 = inlined_call_operand.vmem [shape: f32[1,512], index: 9, kind: input, shape index: {}]   ;;  %s3648_s10 = inlined_call_operand.vmem [shape: f32[1,512], index: 10, kind: input, shape index: {}]   ;;  %s3649_s11 = inlined_call_operand.vmem [shape: f32[1,512], index: 11, kind: input, shape index: {}]   ;;  %s3650_s12 = inlined_call_operand.vmem [shape: f32[1,512], index: 12, kind: input, shape index: {}]   ;;  %s3651_s13 = inlined_call_operand.vmem [shape: f32[16,256], index: 13, kind: output, shape index: {}]  }
   0x1   :  { %19 = vsyncpa [#allocation6], 0  ;;  %s3228_s25 = smov [#allocation5]  }
   0x2   :  { %s45_s26 = sshll.u32 %s3228_s25, 4  ;;  %s46_s26 = int_to_ptr.vmem [resolvable:$true] %s45_s26 }
   0x3   :  { %s3172_s27 = scalar_lea.vmem %s46_s26, 8192  ;;  %p3177_p1 = scmp.lt.s32.totalorder %s46_s26, %s46_s26 }
   0x4   :  { %p3173_p0 = scmp.ne.s32.totalorder %s46_s26, %s3172_s27  ;;  %p3178_p2 = scmp.lt.s32.totalorder %s3172_s27, %s3172_s27 }
   0x6   :  { %p3179_p3 = por %p3178_p2, %p3177_p1 }
   0x8   :  { %p3180_p4 = pnand %p3179_p3, %p3173_p0 }
   0xa   :  { %3183 = shalt.err (!%p3180_p4)
}
   0xb   :  { %s3229_s28 = smov 128   ;;  %s3230_s29 = smov 8  }
   0xc   :  { %51 = dma.hbm_to_vmem [thread:$0]  %s3643_s5, 8192, %s46_s26, [#allocation6], %s3229_s28, %s3229_s28, %s3230_s29  }
   0xd   :  { %s3231_s15 = smov [#allocation3]  }
   0xe   :  { %s31_s16 = sshll.u32 %s3231_s15, 4  ;;  %s32_s16 = int_to_ptr.vmem [resolvable:$true] %s31_s16 }
   0xf   :  { %s3192_s17 = scalar_lea.vmem %s32_s16, 16384  ;;  %p3197_p6 = scmp.lt.s32.totalorder %s32_s16, %s32_s16 }
  0x10   :  { %p3193_p5 = scmp.ne.s32.totalorder %s32_s16, %s3192_s17  ;;  %p3198_p7 = scmp.lt.s32.totalorder %s3192_s17, %s3192_s17 }
  0x12   :  { %p3199_p8 = por %p3198_p7, %p3197_p6 }
  0x14   :  { %p3200_p9 = pnand %p3199_p8, %p3193_p5 }
  0x16   :  { %3203 = shalt.err (!%p3200_p9)
}
  0x17   :  { %s3232_s18 = smov 256   ;;  %s3233_s19 = smov 16  }
  0x18   :  { %37 = dma.hbm_to_vmem [thread:$0]  %s3641_s3, 16384, %s32_s16, [#allocation4], %s3232_s18, %s3232_s18, %s3233_s19  }
  0x19   :  { %s3234_s22 = smov [#allocation7]  }
  0x1a   :  { %s63_s23 = sshll.u32 %s3234_s22, 4  ;;  %s64_s23 = int_to_ptr.vmem [resolvable:$true] %s63_s23 }
  0x1b   :  { %s3212_s5 = scalar_lea.vmem %s64_s23, 4096  ;;  %p3217_p11 = scmp.lt.s32.totalorder %s64_s23, %s64_s23 }
  0x1c   :  { %p3213_p10 = scmp.ne.s32.totalorder %s64_s23, %s3212_s5  ;;  %p3218_p12 = scmp.lt.s32.totalorder %s3212_s5, %s3212_s5 }
  0x1e   :  { %p3219_p13 = por %p3218_p12, %p3217_p11 }
  0x20   :  { %p3220_p0 = pnand %p3219_p13, %p3213_p10 }
  0x22   :  { %3223 = shalt.err (!%p3220_p0)
}
  0x23   :  { %69 = dma.hbm_to_vmem [thread:$0]  %s3645_s7, 4096, %s64_s23, [#allocation6], %s3229_s28, %s3229_s28, %s3230_s29  }
  0x24   :  { %3224 = dma.done.wait [#allocation4], 16384  }
  0x25   :  { %3225 = vsyncadd [#allocation4], 4294950912 }
  0x26   :  { %3226 = dma.done.wait [#allocation6], 12288  }
  0x27   :  { %3227 = vsyncadd [#allocation6], 4294955008  ;;  %v3235_v0 = vmov 0   ;;  %v2771_v1 = vld [vmem:[%s3639_s1 + $0xe4] ss:$16 sps:$4 sm:$0xff]  }
  0x28   :  { %383 = vmatprep.mubr.bf16.mxu1 %v3235_v0  ;;  %v2773_v2 = vld [vmem:[%s3639_s1 + $0xe0] ss:$16 sps:$4 sm:$0xff]   ;;  %351 = vmatprep.subr.bf16.mxu1 %v2771_v1  ;;  %v2774_v3 = vld [vmem:[%s3639_s1 + $0xc4] ss:$16 sps:$4 sm:$0xff]   ;;  %v2798_v17 = vld [vmem:[%s3639_s1 + $0xec] ss:$16 sps:$4 sm:$0xff]  }
  0x29   :  { %352 = vmatpush1.bf16.msra.mxu1 %v2773_v2  ;;  %v2776_v4 = vld [vmem:[%s3639_s1 + $0xc0] ss:$16 sps:$4 sm:$0xff]   ;;  %v2777_v5 = vld [vmem:[%s3639_s1 + $0xa4] ss:$16 sps:$4 sm:$0xff]   ;;  %v2796_v19 = vld [vmem:[%s3639_s1 + $0xe8] ss:$16 sps:$4 sm:$0xff]   ;;  %v165_v2 = vlaneseq }
  0x2a   :  { %353 = vmatprep.subr.bf16.mxu1 %v2774_v3  ;;  %v2779_v6 = vld [vmem:[%s3639_s1 + $0xa0] ss:$16 sps:$4 sm:$0xff]   ;;  %v2780_v7 = vld [vmem:[%s3639_s1 + $0x84] ss:$16 sps:$4 sm:$0xff]   ;;  %v2801_v20 = vld [vmem:[%s3639_s1 + $0xcc] ss:$16 sps:$4 sm:$0xff]  }
  0x2b   :  { %v2782_v8 = vld [vmem:[%s3639_s1 + $0x80] ss:$16 sps:$4 sm:$0xff]   ;;  %v2783_v9 = vld [vmem:[%s3639_s1 + $0x64] ss:$16 sps:$4 sm:$0xff]   ;;  %v2799_v21 = vld [vmem:[%s3639_s1 + $0xc8] ss:$16 sps:$4 sm:$0xff]  }
  0x2c   :  { %v2785_v10 = vld [vmem:[%s3639_s1 + $0x60] ss:$16 sps:$4 sm:$0xff]   ;;  %v2786_v11 = vld [vmem:[%s3639_s1 + $0x44] ss:$16 sps:$4 sm:$0xff]   ;;  %v2804_v22 = vld [vmem:[%s3639_s1 + $0xac] ss:$16 sps:$4 sm:$0xff]  }
  0x2d   :  { %354 = vmatpush1.bf16.msra.mxu1 %v2776_v4  ;;  %v2788_v12 = vld [vmem:[%s3639_s1 + $0x40] ss:$16 sps:$4 sm:$0xff]   ;;  %v2789_v13 = vld [vmem:[%s3639_s1 + $0x24] ss:$16 sps:$4 sm:$0xff]   ;;  %v2802_v23 = vld [vmem:[%s3639_s1 + $0xa8] ss:$16 sps:$4 sm:$0xff]  }
  0x2e   :  { %355 = vmatprep.subr.bf16.mxu1 %v2777_v5  ;;  %v2791_v14 = vld [vmem:[%s3639_s1 + $0x20] ss:$16 sps:$4 sm:$0xff]   ;;  %v2792_v15 = vld [vmem:[%s3639_s1 + $0x4] ss:$16 sps:$4 sm:$0xff]   ;;  %v2807_v24 = vld [vmem:[%s3639_s1 + $0x8c] ss:$16 sps:$4 sm:$0xff]  }
  0x2f   :  { %v2794_v16 = vld [vmem:[%s3639_s1] ss:$16 sps:$4 sm:$0xff]   ;;  %v2805_v25 = vld [vmem:[%s3639_s1 + $0x88] ss:$16 sps:$4 sm:$0xff]   ;;  %v2810_v26 = vld [vmem:[%s3639_s1 + $0x6c] ss:$16 sps:$4 sm:$0xff]  }
  0x30   :  { %v2795_v18 = vld [vmem:[%s3638_s0] sm:$0xff]   ;;  %v2808_v27 = vld [vmem:[%s3639_s1 + $0x68] ss:$16 sps:$4 sm:$0xff]   ;;  %v2813_v28 = vld [vmem:[%s3639_s1 + $0x4c] ss:$16 sps:$4 sm:$0xff]   ;;  %v166_v3 = vshrl.u32 %v165_v2, 7 }
  0x31   :  { %356 = vmatpush1.bf16.msra.mxu1 %v2779_v6  ;;  %v2811_v29 = vld [vmem:[%s3639_s1 + $0x48] ss:$16 sps:$4 sm:$0xff]   ;;  %v2816_v30 = vld [vmem:[%s3639_s1 + $0x2c] ss:$16 sps:$4 sm:$0xff]   ;;  %v2820_v34 = vld [vmem:[#allocation3 + $0xe4] ss:$16 sps:$4 sm:$0xff]  }
  0x32   :  { %357 = vmatprep.subr.bf16.mxu1 %v2780_v7  ;;  %v2814_v31 = vld [vmem:[%s3639_s1 + $0x28] ss:$16 sps:$4 sm:$0xff]   ;;  %v2819_v32 = vld [vmem:[%s3639_s1 + $0xc] ss:$16 sps:$4 sm:$0xff]   ;;  %v2822_v35 = vld [vmem:[#allocation3 + $0x2e0] ss:$16 sps:$4 sm:$0xff]   ;;  %1372 = vmatprep.subr.bf16.mxu0 %v2820_v34 }
  0x33   :  { %v2817_v33 = vld [vmem:[%s3639_s1 + $0x8] ss:$16 sps:$4 sm:$0xff]   ;;  %v2824_v36 = vld [vmem:[#allocation3 + $0x2e4] ss:$16 sps:$4 sm:$0xff]   ;;  %v2825_v37 = vld [vmem:[#allocation3 + $0xe0] ss:$16 sps:$4 sm:$0xff]  }
  0x34   :  { %v2826_v38 = vld [vmem:[#allocation3 + $0xc4] ss:$16 sps:$4 sm:$0xff]   ;;  %1373 = vmatpush1.bf16.msra.mxu0 %v2825_v37  ;;  %v2828_v40 = vld [vmem:[#allocation3 + $0x2c0] ss:$16 sps:$4 sm:$0xff]   ;;  %v3414_v5 = vsub.s32 1, %v166_v3  ;;  %v3416_v6 = vsub.s32 0, %v166_v3 }
  0x35   :  { %358 = vmatpush1.bf16.msra.mxu1 %v2782_v8  ;;  %v2830_v39 = vld [vmem:[#allocation3 + $0x2c4] ss:$16 sps:$4 sm:$0xff]   ;;  %v2831_v41 = vld [vmem:[#allocation3 + $0xc0] ss:$16 sps:$4 sm:$0xff]   ;;  %1374 = vmatprep.subr.bf16.mxu0 %v2826_v38 }
  0x36   :  { %359 = vmatprep.subr.bf16.mxu1 %v2783_v9  ;;  %v2832_v42 = vld [vmem:[#allocation3 + $0xa4] ss:$16 sps:$4 sm:$0xff]   ;;  %v2834_v44 = vld [vmem:[#allocation3 + $0x2a0] ss:$16 sps:$4 sm:$0xff]  }
  0x37   :  { %v2836_v43 = vld [vmem:[#allocation3 + $0x2a4] ss:$16 sps:$4 sm:$0xff]   ;;  %v2837_v45 = vld [vmem:[#allocation3 + $0xa0] ss:$16 sps:$4 sm:$0xff]  }
  0x38   :  { %1375 = vmatpush1.bf16.msra.mxu0 %v2831_v41  ;;  %v2838_v46 = vld [vmem:[#allocation3 + $0x84] ss:$16 sps:$4 sm:$0xff]   ;;  %v2840_v48 = vld [vmem:[#allocation3 + $0x280] ss:$16 sps:$4 sm:$0xff]  }
  0x39   :  { %360 = vmatpush1.bf16.msra.mxu1 %v2785_v10  ;;  %1376 = vmatprep.subr.bf16.mxu0 %v2832_v42  ;;  %v2842_v47 = vld [vmem:[#allocation3 + $0x284] ss:$16 sps:$4 sm:$0xff]   ;;  %v2843_v49 = vld [vmem:[#allocation3 + $0x80] ss:$16 sps:$4 sm:$0xff]  }
  0x3a   :  { %361 = vmatprep.subr.bf16.mxu1 %v2786_v11  ;;  %v2844_v50 = vld [vmem:[#allocation3 + $0x64] ss:$16 sps:$4 sm:$0xff]   ;;  %v2846_v52 = vld [vmem:[#allocation3 + $0x260] ss:$16 sps:$4 sm:$0xff]  }
  0x3b   :  { %v2848_v51 = vld [vmem:[#allocation3 + $0x264] ss:$16 sps:$4 sm:$0xff]   ;;  %v2849_v53 = vld [vmem:[#allocation3 + $0x60] ss:$16 sps:$4 sm:$0xff]  }
  0x3c   :  { %1377 = vmatpush1.bf16.msra.mxu0 %v2837_v45  ;;  %v2850_v54 = vld [vmem:[#allocation3 + $0x44] ss:$16 sps:$4 sm:$0xff]   ;;  %v2852_v56 = vld [vmem:[#allocation3 + $0x240] ss:$16 sps:$4 sm:$0xff]  }
  0x3d   :  { %362 = vmatpush1.bf16.msra.mxu1 %v2788_v12  ;;  %1378 = vmatprep.subr.bf16.mxu0 %v2838_v46  ;;  %v2854_v55 = vld [vmem:[#allocation3 + $0x244] ss:$16 sps:$4 sm:$0xff]   ;;  %v2855_v57 = vld [vmem:[#allocation3 + $0x40] ss:$16 sps:$4 sm:$0xff]  }
  0x3e   :  { %363 = vmatprep.subr.bf16.mxu1 %v2789_v13  ;;  %v2856_v58 = vld [vmem:[#allocation3 + $0x24] ss:$16 sps:$4 sm:$0xff]   ;;  %v2858_v60 = vld [vmem:[#allocation3 + $0x220] ss:$16 sps:$4 sm:$0xff]  }
  0x3f   :  { %v2860_v59 = vld [vmem:[#allocation3 + $0x224] ss:$16 sps:$4 sm:$0xff]   ;;  %v2861_v61 = vld [vmem:[#allocation3 + $0x20] ss:$16 sps:$4 sm:$0xff]  }
  0x40   :  { %1379 = vmatpush1.bf16.msra.mxu0 %v2843_v49  ;;  %v2862_v62 = vld [vmem:[#allocation3 + $0x4] ss:$16 sps:$4 sm:$0xff]   ;;  %v2867_v1 = vld [vmem:[#allocation3] ss:$16 sps:$4 sm:$0xff]  }
  0x41   :  { %364 = vmatpush1.bf16.msra.mxu1 %v2791_v14  ;;  %1380 = vmatprep.subr.bf16.mxu0 %v2844_v50  ;;  %v2866_v63 = vld [vmem:[#allocation3 + $0x204] ss:$16 sps:$4 sm:$0xff]   ;;  %v163_v7 = vld [vmem:[%s3640_s2] sm:$0xf] }
  0x42   :  { %365 = vmatprep.subr.bf16.mxu1 %v2792_v15  ;;  %v172_v9 = vrot.slane %v163_v7, %v3414_v5  ;;  %v168_v10 = vrot.slane %v163_v7, %v3416_v6  ;;  %v2872_v2 = vld [vmem:[#allocation3 + $0x3e4] ss:$16 sps:$4 sm:$0xff]  }
  0x44   :  { %1381 = vmatpush1.bf16.msra.mxu0 %v2849_v53 }
  0x45   :  { %366 = vmatpush1.bf16.msra.mxu1 %v2794_v16  ;;  %1382 = vmatprep.subr.bf16.mxu0 %v2850_v54  ;;  %v3428_v16 = vsub.s32 2, %v166_v3 }
  0x46   :  { %394 = vmatprep.subr.bf16.mxu1 %v2798_v17 }
  0x48   :  { %384 = vmatmul.mubr.bf16.vlgmr.msra.gmra.mxu1 %v2795_v18  ;;  %1383 = vmatpush1.bf16.msra.mxu0 %v2855_v57 }
  0x49   :  { %395 = vmatpush1.bf16.msra.mxu1 %v2796_v19  ;;  %426 = vmatprep.mubr.bf16.mxu1 %v3235_v0  ;;  %v2864_v0 = vld [vmem:[#allocation3 + $0x200] ss:$16 sps:$4 sm:$0xff]  }
  0x4a   :  { %396 = vmatprep.subr.bf16.mxu1 %v2801_v20  ;;  %1384 = vmatprep.subr.bf16.mxu0 %v2856_v58  ;;  %v3436_v20 = vsub.s32 3, %v166_v3  ;;  %v2870_v3 = vld [vmem:[#allocation3 + $0x3e0] ss:$16 sps:$4 sm:$0xff]  }
  0x4c   :  { %1385 = vmatpush1.bf16.msra.mxu0 %v2861_v61 }
  0x4d   :  { %397 = vmatpush1.bf16.msra.mxu1 %v2799_v21  ;;  %1386 = vmatprep.subr.bf16.mxu0 %v2862_v62  ;;  %v176_v21 = vrot.slane %v163_v7, %v3428_v16 }
  0x4e   :  { %398 = vmatprep.subr.bf16.mxu1 %v2804_v22 }
  0x50   :  { %1387 = vmatpush1.bf16.msra.mxu0 %v2867_v1  ;;  %v2868_v1 = vld [vmem:[#allocation3 + $0x1e4] ss:$16 sps:$4 sm:$0xff]  }
  0x51   :  { %399 = vmatpush1.bf16.msra.mxu1 %v2802_v23  ;;  %1388 = vmatprep.subr.bf16.mxu0 %v2868_v1 }
  0x52   :  { %400 = vmatprep.subr.bf16.mxu1 %v2807_v24 }
  0x55   :  { %401 = vmatpush1.bf16.msra.mxu1 %v2805_v25  ;;  %v180_v25 = vrot.slane %v163_v7, %v3436_v20  ;;  %v2874_v7 = vld [vmem:[#allocation3 + $0x1c4] ss:$16 sps:$4 sm:$0xff]  }
  0x56   :  { %402 = vmatprep.subr.bf16.mxu1 %v2810_v26 }
  0x59   :  { %403 = vmatpush1.bf16.msra.mxu1 %v2808_v27 }
  0x5a   :  { %404 = vmatprep.subr.bf16.mxu1 %v2813_v28 }
  0x5d   :  { %405 = vmatpush1.bf16.msra.mxu1 %v2811_v29 }
  0x5e   :  { %406 = vmatprep.subr.bf16.mxu1 %v2816_v30 }
  0x61   :  { %407 = vmatpush1.bf16.msra.mxu1 %v2814_v31 }
  0x62   :  { %408 = vmatprep.subr.bf16.mxu1 %v2819_v32 }
  0x65   :  { %409 = vmatpush1.bf16.msra.mxu1 %v2817_v33 }
  0x66   :  { %1415 = vmatprep.subr.bf16.mxu1 %v2824_v36 }
  0x68   :  { %427 = vmatmul.mubr.bf16.vlgmr.msra.gmra.mxu1 %v2795_v18 }
  0x69   :  { %1416 = vmatpush1.bf16.msra.mxu1 %v2822_v35 }
  0x6a   :  { %1417 = vmatprep.subr.bf16.mxu1 %v2830_v39 }
  0x6d   :  { %1418 = vmatpush1.bf16.msra.mxu1 %v2828_v40 }
  0x6e   :  { %1419 = vmatprep.subr.bf16.mxu1 %v2836_v43 }
  0x71   :  { %1420 = vmatpush1.bf16.msra.mxu1 %v2834_v44 }
  0x72   :  { %1421 = vmatprep.subr.bf16.mxu1 %v2842_v47 }
  0x75   :  { %1422 = vmatpush1.bf16.msra.mxu1 %v2840_v48 }
  0x76   :  { %1423 = vmatprep.subr.bf16.mxu1 %v2848_v51 }
  0x79   :  { %1424 = vmatpush1.bf16.msra.mxu1 %v2846_v52 }
  0x7a   :  { %1425 = vmatprep.subr.bf16.mxu1 %v2854_v55 }
  0x7d   :  { %1426 = vmatpush1.bf16.msra.mxu1 %v2852_v56 }
  0x7e   :  { %1427 = vmatprep.subr.bf16.mxu1 %v2860_v59 }
  0x81   :  { %1428 = vmatpush1.bf16.msra.mxu1 %v2858_v60 }
  0x82   :  { %1429 = vmatprep.subr.bf16.mxu1 %v2866_v63 }
  0x85   :  { %1430 = vmatpush1.bf16.msra.mxu1 %v2864_v0 }
  0x86   :  { %1431 = vmatprep.subr.bf16.mxu1 %v2872_v2 }
  0x89   :  { %1432 = vmatpush2.bf16.msra.mxu1 %v2870_v3 }
 0x108   :  { %v385_v4 = vpop.f32.mrf.mxu1 }
 0x109   :  { %v3425_v13 = vadd.f32 %v385_v4, %v168_v10  ;;  %v2873_v4 = vld [vmem:[#allocation3 + $0x1e0] ss:$16 sps:$4 sm:$0xff]  }
 0x10a   :  { %v387_v8 = vpop.f32.mrf.mxu1  ;;  %1389 = vmatpush2.bf16.msra.mxu0 %v2873_v4 }
 0x10b   :  { %v3423_v12 = vadd.f32 %v387_v8, %v172_v9  ;;  %v445_v18 = vmul.f32 0.1, %v3425_v13  ;;  %vm437_vm1 = vcmp.gt.f32.partialorder %v3425_v13, 0.0  ;;  %v2878_v8 = vld [vmem:[#allocation3 + $0x3c4] ss:$16 sps:$4 sm:$0xff]   ;;  %1390 = vmatprep.subr.bf16.mxu0 %v2874_v7 }
 0x10c   :  { %v389_v11 = vpop.f32.mrf.mxu1  ;;  %1433 = vmatprep.subr.bf16.mxu1 %v2878_v8  ;;  %v461_v7 = vld [vmem:[%s3647_s9] sm:$0xf] }
 0x10d   :  { %v446_v15 = vmul.f32 0.1, %v3423_v12  ;;  %v3430_v17 = vadd.f32 %v389_v11, %v168_v10  ;;  %vm438_vm0 = vcmp.gt.f32.partialorder %v3423_v12, 0.0  ;;  %v3448_v26 = vsel %vm437_vm1, %v3425_v13, %v445_v18  ;;  %v2879_v10 = vld [vmem:[#allocation3 + $0x1c0] ss:$16 sps:$4 sm:$0xff]  }
 0x10e   :  { %v391_v14 = vpop.f32.mrf.mxu1  ;;  %v476_v31 = vmul.f32 %v3448_v26, %v3448_v26  ;;  %1391 = vmatpush2.bf16.msra.mxu0 %v2879_v10  ;;  %v2880_v11 = vld [vmem:[#allocation3 + $0x1a4] ss:$16 sps:$4 sm:$0xff]   ;;  %v2885_v18 = vld [vmem:[#allocation3 + $0x1a0] ss:$16 sps:$4 sm:$0xff]  }
 0x10f   :  { %v3434_v19 = vadd.f32 %v391_v14, %v172_v9  ;;  %v3441_v22 = vsel %vm438_vm0, %v3423_v12, %v446_v15  ;;  %v449_v23 = vmul.f32 0.1, %v3430_v17  ;;  %vm441_vm2 = vcmp.gt.f32.partialorder %v3430_v17, 0.0  ;;  %v2876_v9 = vld [vmem:[#allocation3 + $0x3c0] ss:$16 sps:$4 sm:$0xff]   ;;  %1392 = vmatprep.subr.bf16.mxu0 %v2880_v11 }
 0x110   :  { %v477_v28 = vmul.f32 %v3441_v22, %v3441_v22  ;;  %v463_v37 = vadd.f32 %v3441_v22, %v3448_v26  ;;  %1434 = vmatpush2.bf16.msra.mxu1 %v2876_v9  ;;  %v2884_v14 = vld [vmem:[#allocation3 + $0x3a4] ss:$16 sps:$4 sm:$0xff]   ;;  %v2882_v15 = vld [vmem:[#allocation3 + $0x3a0] ss:$16 sps:$4 sm:$0xff]  }
 0x111   :  { %v450_v24 = vmul.f32 0.1, %v3434_v19  ;;  %vm442_vm3 = vcmp.gt.f32.partialorder %v3434_v19, 0.0  ;;  %v3458_v32 = vsel %vm441_vm2, %v3430_v17, %v449_v23  ;;  %1435 = vmatprep.subr.bf16.mxu1 %v2884_v14  ;;  %v2888_v23 = vld [vmem:[#allocation3 + $0x380] ss:$16 sps:$4 sm:$0xff]  }
 0x112   :  { %v484_v38 = vadd.f32 %v477_v28, %v476_v31  ;;  %v480_v45 = vmul.f32 %v3458_v32, %v3458_v32  ;;  %1393 = vmatpush2.bf16.msra.mxu0 %v2885_v18  ;;  %v2896_v28 = vld [vmem:[#allocation3 + $0x364] ss:$16 sps:$4 sm:$0xff]   ;;  %v2897_v31 = vld [vmem:[#allocation3 + $0x160] ss:$16 sps:$4 sm:$0xff]  }
 0x113   :  { %v3465_v35 = vsel %vm442_vm3, %v3434_v19, %v450_v24  ;;  %v2890_v24 = vld [vmem:[#allocation3 + $0x384] ss:$16 sps:$4 sm:$0xff]   ;;  %v462_v14 = vld [vmem:[%s3648_s10] sm:$0xf] }
 0x114   :  { %v481_v46 = vmul.f32 %v3465_v35, %v3465_v35  ;;  %v468_v53 = vadd.f32 %v3465_v35, %v3458_v32  ;;  %1436 = vmatpush2.bf16.msra.mxu1 %v2882_v15 }
 0x115   :  { %1437 = vmatprep.subr.bf16.mxu1 %v2890_v24  ;;  %v536_v24 = vrot.slane %v461_v7, %v3436_v20 }
 0x116   :  { %v489_v59 = vadd.f32 %v481_v46, %v480_v45  ;;  %v2910_v45 = vld [vmem:[#allocation3 + $0x104] ss:$16 sps:$4 sm:$0xff]  }
 0x117   :  { %v2914_v46 = vld [vmem:[#allocation3 + $0x304] ss:$16 sps:$4 sm:$0xff]  }
 0x118   :  { %1438 = vmatpush2.bf16.msra.mxu1 %v2888_v23 }
 0x119   :  { %1439 = vmatprep.subr.bf16.mxu1 %v2896_v28  ;;  %v557_v28 = vrot.slane %v462_v14, %v3414_v5 }
 0x128   :  { %v428_v27 = vpop.f32.mrf.mxu1 }
 0x129   :  { %v3453_v29 = vadd.f32 %v428_v27, %v176_v21  ;;  %v2892_v27 = vld [vmem:[#allocation3 + $0x164] ss:$16 sps:$4 sm:$0xff]  }
 0x12a   :  { %v430_v30 = vpop.f32.mrf.mxu1 }
 0x12b   :  { %v447_v33 = vmul.f32 0.1, %v3453_v29  ;;  %v3461_v34 = vadd.f32 %v430_v30, %v180_v25  ;;  %vm439_vm4 = vcmp.gt.f32.partialorder %v3453_v29, 0.0  ;;  %v2894_v30 = vld [vmem:[#allocation3 + $0x360] ss:$16 sps:$4 sm:$0xff]  }
 0x12c   :  { %v432_v36 = vpop.f32.mrf.mxu1  ;;  %1440 = vmatpush2.bf16.msra.mxu1 %v2894_v30 }
 0x12d   :  { %v3469_v39 = vadd.f32 %v432_v36, %v176_v21  ;;  %vm440_vm5 = vcmp.gt.f32.partialorder %v3461_v34, 0.0  ;;  %v448_v40 = vmul.f32 0.1, %v3461_v34  ;;  %v3474_v41 = vsel %vm439_vm4, %v3453_v29, %v447_v33  ;;  %v2886_v21 = vld [vmem:[#allocation3 + $0x184] ss:$16 sps:$4 sm:$0xff]  }
 0x12e   :  { %v434_v42 = vpop.f32.mrf.mxu1  ;;  %v464_v43 = vadd.f32 %v463_v37, %v3474_v41  ;;  %v478_v44 = vmul.f32 %v3474_v41, %v3474_v41  ;;  %1394 = vmatprep.subr.bf16.mxu0 %v2886_v21  ;;  %v2898_v33 = vld [vmem:[#allocation3 + $0x144] ss:$16 sps:$4 sm:$0xff]   ;;  %v2900_v37 = vld [vmem:[#allocation3 + $0x340] ss:$16 sps:$4 sm:$0xff]   ;;  %v528_v21 = vrot.slane %v461_v7, %v3414_v5 }
 0x12f   :  { %v451_v47 = vmul.f32 0.1, %v3469_v39  ;;  %v3484_v48 = vadd.f32 %v434_v42, %v180_v25  ;;  %v3487_v49 = vsel %vm440_vm5, %v3461_v34, %v448_v40  ;;  %vm443_vm6 = vcmp.gt.f32.partialorder %v3469_v39, 0.0  ;;  %v2891_v25 = vld [vmem:[#allocation3 + $0x180] ss:$16 sps:$4 sm:$0xff]  }
 0x130   :  { %v465_v50 = vadd.f32 %v464_v43, %v3487_v49  ;;  %v479_v51 = vmul.f32 %v3487_v49, %v3487_v49  ;;  %v485_v52 = vadd.f32 %v484_v38, %v478_v44  ;;  %1395 = vmatpush2.bf16.msra.mxu0 %v2891_v25  ;;  %v2902_v36 = vld [vmem:[#allocation3 + $0x344] ss:$16 sps:$4 sm:$0xff]   ;;  %v2903_v38 = vld [vmem:[#allocation3 + $0x140] ss:$16 sps:$4 sm:$0xff]  }
 0x131   :  { %vm444_vm7 = vcmp.gt.f32.partialorder %v3484_v48, 0.0  ;;  %v452_v54 = vmul.f32 0.1, %v3484_v48  ;;  %v3498_v55 = vsel %vm443_vm6, %v3469_v39, %v451_v47  ;;  %1396 = vmatprep.subr.bf16.mxu0 %v2892_v27  ;;  %1441 = vmatprep.subr.bf16.mxu1 %v2902_v36  ;;  %v2904_v40 = vld [vmem:[#allocation3 + $0x124] ss:$16 sps:$4 sm:$0xff]  }
 0x132   :  { %466 = vadd.xlane.f32.xlu0 %v465_v50  ;;  %v486_v56 = vadd.f32 %v485_v52, %v479_v51  ;;  %v469_v57 = vadd.f32 %v468_v53, %v3498_v55  ;;  %v482_v58 = vmul.f32 %v3498_v55, %v3498_v55  ;;  %v2908_v42 = vld [vmem:[#allocation3 + $0x324] ss:$16 sps:$4 sm:$0xff]   ;;  %1442 = vmatpush2.bf16.msra.mxu1 %v2900_v37  ;;  %v2906_v43 = vld [vmem:[#allocation3 + $0x320] ss:$16 sps:$4 sm:$0xff]   ;;  %v2918_v51 = vld [vmem:[#allocation3 + $0xec] ss:$16 sps:$4 sm:$0xff]  }
 0x133   :  { %v3504_v60 = vsel %vm444_vm7, %v3484_v48, %v452_v54  ;;  %v2909_v44 = vld [vmem:[#allocation3 + $0x120] ss:$16 sps:$4 sm:$0xff]   ;;  %1443 = vmatprep.subr.bf16.mxu1 %v2908_v42  ;;  %v2921_v52 = vld [vmem:[#allocation3 + $0x2ec] ss:$16 sps:$4 sm:$0xff]   ;;  %v553_v37 = vrot.slane %v462_v14, %v3416_v6 }
 0x134   :  { %487 = vadd.xlane.f32.xlu1 %v486_v56  ;;  %v470_v61 = vadd.f32 %v469_v57, %v3504_v60  ;;  %v483_v62 = vmul.f32 %v3504_v60, %v3504_v60  ;;  %v490_v63 = vadd.f32 %v489_v59, %v482_v58  ;;  %1397 = vmatpush2.bf16.msra.mxu0 %v2897_v31  ;;  %v2912_v47 = vld [vmem:[#allocation3 + $0x300] ss:$16 sps:$4 sm:$0xff]  }
 0x135   :  { %1398 = vmatprep.subr.bf16.mxu0 %v2898_v33  ;;  %v2915_v50 = vld [vmem:[#allocation3 + $0x100] ss:$16 sps:$4 sm:$0xff]  }
 0x136   :  { %471 = vadd.xlane.f32.xlu0 %v470_v61  ;;  %v491_v0 = vadd.f32 %v490_v63, %v483_v62  ;;  %1444 = vmatpush2.bf16.msra.mxu1 %v2906_v43 }
 0x137   :  { %1445 = vmatprep.subr.bf16.mxu1 %v2914_v46 }
 0x138   :  { %492 = vadd.xlane.f32.xlu1 %v491_v0  ;;  %1399 = vmatpush2.bf16.msra.mxu0 %v2903_v38  ;;  %v561_v38 = vrot.slane %v462_v14, %v3428_v16 }
 0x139   :  { %1400 = vmatprep.subr.bf16.mxu0 %v2904_v40 }
 0x13a   :  { %1446 = vmatpush2.bf16.msra.mxu1 %v2912_v47 }
 0x13b   :  { %1501 = vmatprep.subr.bf16.mxu1 %v2921_v52 }
 0x13c   :  { %1401 = vmatpush2.bf16.msra.mxu0 %v2909_v44 }
 0x13d   :  { %1402 = vmatprep.subr.bf16.mxu0 %v2910_v45 }
 0x140   :  { %1403 = vmatpush2.bf16.msra.mxu0 %v2915_v50 }
 0x141   :  { %1458 = vmatprep.subr.bf16.mxu0 %v2918_v51 }
 0x1bb   :  { %v467_v53 = vpop.xlane.xlu0 %466 }
 0x1bc   :  { %v474_v54 = vmul.f32 0.001953125, %v467_v53 }
 0x1bd   :  { %v488_v56 = vpop.xlane.xlu1 %487 }
 0x1be   :  { %v494_v57 = vmul.f32 0.001953125, %v488_v56  ;;  %v496_v58 = vmul.f32 %v474_v54, %v474_v54  ;;  %v505_v8 = vsub.f32 %v3441_v22, %v474_v54  ;;  %v507_v9 = vsub.f32 %v3487_v49, %v474_v54 }
 0x1bf   :  { %v472_v59 = vpop.xlane.xlu0 %471  ;;  %v506_v11 = vsub.f32 %v3474_v41, %v474_v54  ;;  %v504_v15 = vsub.f32 %v3448_v26, %v474_v54  ;;  %v524_v22 = vrot.slane %v461_v7, %v3416_v6  ;;  %v532_v49 = vrot.slane %v461_v7, %v3428_v16  ;;  %v2922_v7 = vld [vmem:[#allocation3 + $0xc8] ss:$16 sps:$4 sm:$0xff]  }
 0x1c0   :  { %v498_v61 = vsub.f32 %v494_v57, %v496_v58  ;;  %v475_v62 = vmul.f32 0.001953125, %v472_v59  ;;  %v565_v26 = vrot.slane %v462_v14, %v3436_v20  ;;  %v2931_v14 = vld [vmem:[#allocation3 + $0x2a8] ss:$16 sps:$4 sm:$0xff]  }
 0x1c1   :  { %v493_v63 = vpop.xlane.xlu1 %492 }
 0x1c2   :  { %v500_v0 = vadd.f32 1e-05, %v498_v61  ;;  %v495_v1 = vmul.f32 0.001953125, %v493_v63  ;;  %v497_v2 = vmul.f32 %v475_v62, %v475_v62  ;;  %v509_v41 = vsub.f32 %v3465_v35, %v475_v62  ;;  %v2916_v63 = vld [vmem:[#allocation3 + $0xe8] ss:$16 sps:$4 sm:$0xff]  }
 0x1c3   :  { %v511_v30 = vsub.f32 %v3504_v60, %v475_v62  ;;  %v510_v33 = vsub.f32 %v3498_v55, %v475_v62  ;;  %v508_v36 = vsub.f32 %v3458_v32, %v475_v62 }
 0x1c4   :  { %3156 = vrsqrt.f32 %v500_v0  ;;  %v499_v3 = vsub.f32 %v495_v1, %v497_v2  ;;  %v2919_v0 = vld [vmem:[#allocation3 + $0x2e8] ss:$16 sps:$4 sm:$0xff]  }
 0x1c6   :  { %v501_v4 = vadd.f32 1e-05, %v499_v3  ;;  %v2924_v3 = vld [vmem:[#allocation3 + $0xcc] ss:$16 sps:$4 sm:$0xff]  }
 0x1c8   :  { %3158 = vrsqrt.f32 %v501_v4  ;;  %v2927_v4 = vld [vmem:[#allocation3 + $0x2cc] ss:$16 sps:$4 sm:$0xff]  }
 0x1d1   :  { %v3157_v10 = vpop.eup %3156 }
 0x1d2   :  { %v513_v18 = vmul.f32 %v3157_v10, %v505_v8  ;;  %v515_v23 = vmul.f32 %v3157_v10, %v507_v9  ;;  %v512_v25 = vmul.f32 %v3157_v10, %v504_v15  ;;  %v514_v27 = vmul.f32 %v3157_v10, %v506_v11  ;;  %v2925_v8 = vld [vmem:[#allocation3 + $0x2c8] ss:$16 sps:$4 sm:$0xff]   ;;  %v2930_v9 = vld [vmem:[#allocation3 + $0xac] ss:$16 sps:$4 sm:$0xff]  }
 0x1d3   :  { %v2933_v10 = vld [vmem:[#allocation3 + $0x2ac] ss:$16 sps:$4 sm:$0xff]   ;;  %v2928_v11 = vld [vmem:[#allocation3 + $0xa8] ss:$16 sps:$4 sm:$0xff]  }
 0x1d4   :  { %v542_v42 = vmul.f32 %v528_v21, %v513_v18  ;;  %v544_v44 = vmul.f32 %v536_v24, %v515_v23  ;;  %v541_v45 = vmul.f32 %v524_v22, %v512_v25  ;;  %v543_v47 = vmul.f32 %v532_v49, %v514_v27  ;;  %v2936_v15 = vld [vmem:[#allocation3 + $0x8c] ss:$16 sps:$4 sm:$0xff]   ;;  %v2937_v23 = vld [vmem:[#allocation3 + $0x288] ss:$16 sps:$4 sm:$0xff]  }
 0x1d5   :  { %v3159_v31 = vpop.eup %3158  ;;  %v2939_v18 = vld [vmem:[#allocation3 + $0x28c] ss:$16 sps:$4 sm:$0xff]   ;;  %v2943_v27 = vld [vmem:[#allocation3 + $0x268] ss:$16 sps:$4 sm:$0xff]  }
 0x1d6   :  { %v517_v40 = vmul.f32 %v3159_v31, %v509_v41  ;;  %v519_v43 = vmul.f32 %v3159_v31, %v511_v30  ;;  %v516_v35 = vmul.f32 %v3159_v31, %v508_v36  ;;  %v518_v46 = vmul.f32 %v3159_v31, %v510_v33  ;;  %v2945_v25 = vld [vmem:[#allocation3 + $0x26c] ss:$16 sps:$4 sm:$0xff]   ;;  %v2949_v30 = vld [vmem:[#allocation3 + $0x248] ss:$16 sps:$4 sm:$0xff]  }
 0x1d7   :  { %v571_v53 = vadd.f32 %v557_v28, %v542_v42  ;;  %v573_v54 = vadd.f32 %v565_v26, %v544_v44  ;;  %v570_v56 = vadd.f32 %v553_v37, %v541_v45  ;;  %v572_v58 = vadd.f32 %v561_v38, %v543_v47  ;;  %v2951_v41 = vld [vmem:[#allocation3 + $0x24c] ss:$16 sps:$4 sm:$0xff]   ;;  %v2952_v33 = vld [vmem:[#allocation3 + $0x28] ss:$16 sps:$4 sm:$0xff]  }
 0x1d8   :  { %v546_v60 = vmul.f32 %v528_v21, %v517_v40  ;;  %v548_v50 = vmul.f32 %v536_v24, %v519_v43  ;;  %v545_v51 = vmul.f32 %v524_v22, %v516_v35  ;;  %v547_v52 = vmul.f32 %v532_v49, %v518_v46  ;;  %v2934_v21 = vld [vmem:[#allocation3 + $0x88] ss:$16 sps:$4 sm:$0xff]   ;;  %v2942_v24 = vld [vmem:[#allocation3 + $0x6c] ss:$16 sps:$4 sm:$0xff]  }
 0x1d9   :  { %v2940_v22 = vld [vmem:[#allocation3 + $0x68] ss:$16 sps:$4 sm:$0xff]   ;;  %v2948_v49 = vld [vmem:[#allocation3 + $0x4c] ss:$16 sps:$4 sm:$0xff]  }
 0x1da   :  { %v575_v55 = vadd.f32 %v557_v28, %v546_v60  ;;  %v577_v32 = vadd.f32 %v565_v26, %v548_v50  ;;  %v574_v57 = vadd.f32 %v553_v37, %v545_v51  ;;  %v576_v59 = vadd.f32 %v561_v38, %v547_v52  ;;  %v2946_v28 = vld [vmem:[#allocation3 + $0x48] ss:$16 sps:$4 sm:$0xff]   ;;  %v2954_v26 = vld [vmem:[#allocation3 + $0x2c] ss:$16 sps:$4 sm:$0xff]  }
 0x1db   :  { %v2957_v31 = vld [vmem:[#allocation3 + $0x22c] ss:$16 sps:$4 sm:$0xff]   ;;  %v2955_v36 = vld [vmem:[#allocation3 + $0x228] ss:$16 sps:$4 sm:$0xff]  }
 0x1dc   :  { %v579_v61 = vpack.c.bf16 %v575_v55, %v571_v53  ;;  %v581_v62 = vpack.c.bf16 %v577_v32, %v573_v54  ;;  %v3531_v1 = vpack.c.bf16 %v574_v57, %v570_v56  ;;  %v3533_v2 = vpack.c.bf16 %v576_v59, %v572_v58  ;;  %v2960_v37 = vld [vmem:[#allocation3 + $0xc] ss:$16 sps:$4 sm:$0xff]   ;;  %v2958_v40 = vld [vmem:[#allocation3 + $0x8] ss:$16 sps:$4 sm:$0xff]  }
 0x1dd   :  { %v2963_v38 = vld [vmem:[#allocation3 + $0x20c] ss:$16 sps:$4 sm:$0xff]   ;;  %v2961_v42 = vld [vmem:[#allocation3 + $0x208] ss:$16 sps:$4 sm:$0xff]  }
 0x1de   :  { %1404 = vmatprep.mubr.bf16.mxu0 %v579_v61  ;;  %1447 = vmatprep.mubr.bf16.mxu1 %v581_v62  ;;  %v2966_v43 = vld [vmem:[#allocation3 + $0x1ec] ss:$16 sps:$4 sm:$0xff]   ;;  %v2964_v35 = vld [vmem:[#allocation3 + $0x1e8] ss:$16 sps:$4 sm:$0xff]  }
 0x1df   :  { %1405 = vmatmul.mubr.bf16.vlgmr.msra.gmra.mxu0 %v3531_v1  ;;  %1448 = vmatmul.mubr.bf16.vlgmr.msra.gmra.mxu1 %v3533_v2  ;;  %v2969_v44 = vld [vmem:[#allocation3 + $0x3ec] ss:$16 sps:$4 sm:$0xff]   ;;  %v2967_v45 = vld [vmem:[#allocation3 + $0x3e8] ss:$16 sps:$4 sm:$0xff]  }
 0x1e0   :  { %1459 = vmatpush1.bf16.msra.mxu0 %v2916_v63  ;;  %1502 = vmatpush1.bf16.msra.mxu1 %v2919_v0  ;;  %v2972_v46 = vld [vmem:[#allocation3 + $0x1cc] ss:$16 sps:$4 sm:$0xff]   ;;  %v2970_v60 = vld [vmem:[#allocation3 + $0x1c8] ss:$16 sps:$4 sm:$0xff]  }
 0x1e1   :  { %1490 = vmatprep.mubr.bf16.mxu0 %v579_v61  ;;  %1533 = vmatprep.mubr.bf16.mxu1 %v581_v62  ;;  %v2975_v47 = vld [vmem:[#allocation3 + $0x3cc] ss:$16 sps:$4 sm:$0xff]   ;;  %v2973_v50 = vld [vmem:[#allocation3 + $0x3c8] ss:$16 sps:$4 sm:$0xff]  }
 0x1e2   :  { %1460 = vmatprep.subr.bf16.mxu0 %v2924_v3  ;;  %1503 = vmatprep.subr.bf16.mxu1 %v2927_v4  ;;  %v2978_v51 = vld [vmem:[#allocation3 + $0x1ac] ss:$16 sps:$4 sm:$0xff]   ;;  %v2976_v53 = vld [vmem:[#allocation3 + $0x1a8] ss:$16 sps:$4 sm:$0xff]  }
 0x1e3   :  { %v2981_v52 = vld [vmem:[#allocation3 + $0x3ac] ss:$16 sps:$4 sm:$0xff]   ;;  %v2979_v55 = vld [vmem:[#allocation3 + $0x3a8] ss:$16 sps:$4 sm:$0xff]  }
 0x1e4   :  { %1461 = vmatpush1.bf16.msra.mxu0 %v2922_v7  ;;  %1504 = vmatpush1.bf16.msra.mxu1 %v2925_v8  ;;  %v2984_v54 = vld [vmem:[#allocation3 + $0x18c] ss:$16 sps:$4 sm:$0xff]   ;;  %v2982_v56 = vld [vmem:[#allocation3 + $0x188] ss:$16 sps:$4 sm:$0xff]  }
 0x1e5   :  { %1462 = vmatprep.subr.bf16.mxu0 %v2930_v9  ;;  %1505 = vmatprep.subr.bf16.mxu1 %v2933_v10  ;;  %v2987_v32 = vld [vmem:[#allocation3 + $0x38c] ss:$16 sps:$4 sm:$0xff]   ;;  %v2985_v57 = vld [vmem:[#allocation3 + $0x388] ss:$16 sps:$4 sm:$0xff]  }
 0x1e6   :  { %v2990_v58 = vld [vmem:[#allocation3 + $0x16c] ss:$16 sps:$4 sm:$0xff]   ;;  %v2988_v61 = vld [vmem:[#allocation3 + $0x168] ss:$16 sps:$4 sm:$0xff]  }
 0x1e7   :  { %v2993_v59 = vld [vmem:[#allocation3 + $0x36c] ss:$16 sps:$4 sm:$0xff]   ;;  %v2991_v62 = vld [vmem:[#allocation3 + $0x368] ss:$16 sps:$4 sm:$0xff]  }
 0x1e8   :  { %1463 = vmatpush1.bf16.msra.mxu0 %v2928_v11  ;;  %1506 = vmatpush1.bf16.msra.mxu1 %v2931_v14  ;;  %v2996_v63 = vld [vmem:[#allocation3 + $0x14c] ss:$16 sps:$4 sm:$0xff]   ;;  %v2994_v3 = vld [vmem:[#allocation3 + $0x148] ss:$16 sps:$4 sm:$0xff]  }
 0x1e9   :  { %1464 = vmatprep.subr.bf16.mxu0 %v2936_v15  ;;  %1507 = vmatprep.subr.bf16.mxu1 %v2939_v18  ;;  %v2999_v0 = vld [vmem:[#allocation3 + $0x34c] ss:$16 sps:$4 sm:$0xff]   ;;  %v2997_v4 = vld [vmem:[#allocation3 + $0x348] ss:$16 sps:$4 sm:$0xff]  }
 0x1ea   :  { %v3002_v7 = vld [vmem:[#allocation3 + $0x12c] ss:$16 sps:$4 sm:$0xff]   ;;  %v3000_v9 = vld [vmem:[#allocation3 + $0x128] ss:$16 sps:$4 sm:$0xff]  }
 0x1eb   :  { %v3005_v8 = vld [vmem:[#allocation3 + $0x32c] ss:$16 sps:$4 sm:$0xff]   ;;  %v3003_v10 = vld [vmem:[#allocation3 + $0x328] ss:$16 sps:$4 sm:$0xff]  }
 0x1ec   :  { %1465 = vmatpush1.bf16.msra.mxu0 %v2934_v21  ;;  %1508 = vmatpush1.bf16.msra.mxu1 %v2937_v23  ;;  %v3008_v11 = vld [vmem:[#allocation3 + $0x10c] ss:$16 sps:$4 sm:$0xff]   ;;  %v3006_v15 = vld [vmem:[#allocation3 + $0x108] ss:$16 sps:$4 sm:$0xff]  }
 0x1ed   :  { %1466 = vmatprep.subr.bf16.mxu0 %v2942_v24  ;;  %1509 = vmatprep.subr.bf16.mxu1 %v2945_v25  ;;  %v3011_v14 = vld [vmem:[#allocation3 + $0x30c] ss:$16 sps:$4 sm:$0xff]   ;;  %v3009_v18 = vld [vmem:[#allocation3 + $0x308] ss:$16 sps:$4 sm:$0xff]  }
 0x1ee   :  { %v3012_v21 = vld [vmem:[#allocation5 + $0x70] ss:$8 sps:$4 sm:$0xff]   ;;  %v3014_v23 = vld [vmem:[#allocation5 + $0x74] ss:$8 sps:$4 sm:$0xff]  }
 0x1ef   :  { %v3015_v24 = vld [vmem:[#allocation5 + $0x170] ss:$8 sps:$4 sm:$0xff]   ;;  %v3017_v25 = vld [vmem:[#allocation5 + $0x174] ss:$8 sps:$4 sm:$0xff]  }
 0x1f0   :  { %1467 = vmatpush1.bf16.msra.mxu0 %v2940_v22  ;;  %1510 = vmatpush1.bf16.msra.mxu1 %v2943_v27  ;;  %v3020_v22 = vld [vmem:[#allocation5 + $0x64] ss:$8 sps:$4 sm:$0xff]  }
 0x1f1   :  { %1468 = vmatprep.subr.bf16.mxu0 %v2948_v49  ;;  %1511 = vmatprep.subr.bf16.mxu1 %v2951_v41  ;;  %v3023_v27 = vld [vmem:[#allocation5 + $0x164] ss:$8 sps:$4 sm:$0xff]   ;;  %v3018_v49 = vld [vmem:[#allocation5 + $0x60] ss:$8 sps:$4 sm:$0xff]  }
 0x1f2   :  { %v3021_v41 = vld [vmem:[#allocation5 + $0x160] ss:$8 sps:$4 sm:$0xff]  }
 0x1f4   :  { %1469 = vmatpush1.bf16.msra.mxu0 %v2946_v28  ;;  %1512 = vmatpush1.bf16.msra.mxu1 %v2949_v30  ;;  %v3026_v28 = vld [vmem:[#allocation5 + $0x54] ss:$8 sps:$4 sm:$0xff]  }
 0x1f5   :  { %1470 = vmatprep.subr.bf16.mxu0 %v2954_v26  ;;  %1513 = vmatprep.subr.bf16.mxu1 %v2957_v31  ;;  %v3029_v30 = vld [vmem:[#allocation5 + $0x154] ss:$8 sps:$4 sm:$0xff]   ;;  %v3032_v26 = vld [vmem:[#allocation5 + $0x44] ss:$8 sps:$4 sm:$0xff]  }
 0x1f6   :  { %v3035_v31 = vld [vmem:[#allocation5 + $0x144] ss:$8 sps:$4 sm:$0xff]  }
 0x1f8   :  { %1471 = vmatpush1.bf16.msra.mxu0 %v2952_v33  ;;  %1514 = vmatpush1.bf16.msra.mxu1 %v2955_v36  ;;  %v3030_v33 = vld [vmem:[#allocation5 + $0x40] ss:$8 sps:$4 sm:$0xff]  }
 0x1f9   :  { %1472 = vmatprep.subr.bf16.mxu0 %v2960_v37  ;;  %1515 = vmatprep.subr.bf16.mxu1 %v2963_v38  ;;  %v3033_v36 = vld [vmem:[#allocation5 + $0x140] ss:$8 sps:$4 sm:$0xff]   ;;  %v3038_v37 = vld [vmem:[#allocation5 + $0x34] ss:$8 sps:$4 sm:$0xff]  }
 0x1fa   :  { %v3041_v38 = vld [vmem:[#allocation5 + $0x134] ss:$8 sps:$4 sm:$0xff]  }
 0x1fc   :  { %1473 = vmatpush1.bf16.msra.mxu0 %v2958_v40  ;;  %1516 = vmatpush1.bf16.msra.mxu1 %v2961_v42  ;;  %v3036_v40 = vld [vmem:[#allocation5 + $0x30] ss:$8 sps:$4 sm:$0xff]  }
 0x1fd   :  { %1474 = vmatprep.subr.bf16.mxu0 %v2966_v43  ;;  %1517 = vmatprep.subr.bf16.mxu1 %v2969_v44  ;;  %v3039_v42 = vld [vmem:[#allocation5 + $0x130] ss:$8 sps:$4 sm:$0xff]   ;;  %v3044_v43 = vld [vmem:[#allocation5 + $0x24] ss:$8 sps:$4 sm:$0xff]  }
 0x1fe   :  { %v3047_v44 = vld [vmem:[#allocation5 + $0x124] ss:$8 sps:$4 sm:$0xff]  }
 0x200   :  { %1475 = vmatpush2.bf16.msra.mxu0 %v2964_v35  ;;  %1518 = vmatpush2.bf16.msra.mxu1 %v2967_v45  ;;  %v3042_v35 = vld [vmem:[#allocation5 + $0x20] ss:$8 sps:$4 sm:$0xff]  }
 0x201   :  { %1476 = vmatprep.subr.bf16.mxu0 %v2972_v46  ;;  %1519 = vmatprep.subr.bf16.mxu1 %v2975_v47  ;;  %v3045_v45 = vld [vmem:[#allocation5 + $0x120] ss:$8 sps:$4 sm:$0xff]   ;;  %v3050_v46 = vld [vmem:[#allocation5 + $0x14] ss:$8 sps:$4 sm:$0xff]  }
 0x202   :  { %v3053_v47 = vld [vmem:[#allocation5 + $0x114] ss:$8 sps:$4 sm:$0xff]  }
 0x204   :  { %1477 = vmatpush2.bf16.msra.mxu0 %v2970_v60  ;;  %1520 = vmatpush2.bf16.msra.mxu1 %v2973_v50  ;;  %v3048_v60 = vld [vmem:[#allocation5 + $0x10] ss:$8 sps:$4 sm:$0xff]  }
 0x205   :  { %1478 = vmatprep.subr.bf16.mxu0 %v2978_v51  ;;  %1521 = vmatprep.subr.bf16.mxu1 %v2981_v52  ;;  %v3051_v50 = vld [vmem:[#allocation5 + $0x110] ss:$8 sps:$4 sm:$0xff]  }
 0x208   :  { %1479 = vmatpush2.bf16.msra.mxu0 %v2976_v53  ;;  %1522 = vmatpush2.bf16.msra.mxu1 %v2979_v55  ;;  %v710_v53 = vld [vmem:[%s3642_s4] sm:$0xf] }
 0x209   :  { %1480 = vmatprep.subr.bf16.mxu0 %v2984_v54  ;;  %1523 = vmatprep.subr.bf16.mxu1 %v2987_v32  ;;  %v719_v54 = vrot.slane %v710_v53, %v3414_v5  ;;  %v715_v32 = vrot.slane %v710_v53, %v3416_v6 }
 0x20c   :  { %1481 = vmatpush2.bf16.msra.mxu0 %v2982_v56  ;;  %1524 = vmatpush2.bf16.msra.mxu1 %v2985_v57 }
 0x20d   :  { %1482 = vmatprep.subr.bf16.mxu0 %v2990_v58  ;;  %1525 = vmatprep.subr.bf16.mxu1 %v2993_v59 }
 0x210   :  { %1483 = vmatpush2.bf16.msra.mxu0 %v2988_v61  ;;  %1526 = vmatpush2.bf16.msra.mxu1 %v2991_v62 }
 0x211   :  { %1484 = vmatprep.subr.bf16.mxu0 %v2996_v63  ;;  %1527 = vmatprep.subr.bf16.mxu1 %v2999_v0 }
 0x214   :  { %1485 = vmatpush2.bf16.msra.mxu0 %v2994_v3  ;;  %1528 = vmatpush2.bf16.msra.mxu1 %v2997_v4 }
 0x215   :  { %1486 = vmatprep.subr.bf16.mxu0 %v3002_v7  ;;  %1529 = vmatprep.subr.bf16.mxu1 %v3005_v8 }
 0x218   :  { %1487 = vmatpush2.bf16.msra.mxu0 %v3000_v9  ;;  %1530 = vmatpush2.bf16.msra.mxu1 %v3003_v10 }
 0x219   :  { %1488 = vmatprep.subr.bf16.mxu0 %v3008_v11  ;;  %1531 = vmatprep.subr.bf16.mxu1 %v3011_v14  ;;  %v723_v11 = vrot.slane %v710_v53, %v3428_v16 }
 0x21c   :  { %1489 = vmatpush2.bf16.msra.mxu0 %v3006_v15  ;;  %1532 = vmatpush2.bf16.msra.mxu1 %v3009_v18  ;;  %v727_v18 = vrot.slane %v710_v53, %v3436_v20 }
 0x21d   :  { %2092 = vmatprep.subr.bf16.mxu0 %v3014_v23  ;;  %2135 = vmatprep.subr.bf16.mxu1 %v3017_v25 }
 0x21f   :  { %1491 = vmatmul.mubr.bf16.vlgmr.msra.gmra.mxu0 %v3531_v1  ;;  %1534 = vmatmul.mubr.bf16.vlgmr.msra.gmra.mxu1 %v3533_v2  ;;  %v3024_v1 = vld [vmem:[#allocation5 + $0x50] ss:$8 sps:$4 sm:$0xff]  }
 0x220   :  { %2093 = vmatpush1.bf16.msra.mxu0 %v3012_v21  ;;  %2136 = vmatpush1.bf16.msra.mxu1 %v3015_v24  ;;  %v3027_v2 = vld [vmem:[#allocation5 + $0x150] ss:$8 sps:$4 sm:$0xff]  }
 0x221   :  { %2094 = vmatprep.subr.bf16.mxu0 %v3020_v22  ;;  %2137 = vmatprep.subr.bf16.mxu1 %v3023_v27 }
 0x224   :  { %2095 = vmatpush1.bf16.msra.mxu0 %v3018_v49  ;;  %2138 = vmatpush1.bf16.msra.mxu1 %v3021_v41 }
 0x225   :  { %2096 = vmatprep.subr.bf16.mxu0 %v3026_v28  ;;  %2139 = vmatprep.subr.bf16.mxu1 %v3029_v30 }
 0x228   :  { %2097 = vmatpush1.bf16.msra.mxu0 %v3024_v1  ;;  %2140 = vmatpush1.bf16.msra.mxu1 %v3027_v2 }
 0x229   :  { %2098 = vmatprep.subr.bf16.mxu0 %v3032_v26  ;;  %2141 = vmatprep.subr.bf16.mxu1 %v3035_v31 }
 0x22c   :  { %2099 = vmatpush1.bf16.msra.mxu0 %v3030_v33  ;;  %2142 = vmatpush1.bf16.msra.mxu1 %v3033_v36 }
 0x22d   :  { %2100 = vmatprep.subr.bf16.mxu0 %v3038_v37  ;;  %2143 = vmatprep.subr.bf16.mxu1 %v3041_v38 }
 0x230   :  { %2101 = vmatpush1.bf16.msra.mxu0 %v3036_v40  ;;  %2144 = vmatpush1.bf16.msra.mxu1 %v3039_v42 }
 0x231   :  { %2102 = vmatprep.subr.bf16.mxu0 %v3044_v43  ;;  %2145 = vmatprep.subr.bf16.mxu1 %v3047_v44 }
 0x234   :  { %2103 = vmatpush1.bf16.msra.mxu0 %v3042_v35  ;;  %2146 = vmatpush1.bf16.msra.mxu1 %v3045_v45 }
 0x235   :  { %2104 = vmatprep.subr.bf16.mxu0 %v3050_v46  ;;  %2147 = vmatprep.subr.bf16.mxu1 %v3053_v47 }
 0x238   :  { %2105 = vmatpush1.bf16.msra.mxu0 %v3048_v60  ;;  %2148 = vmatpush1.bf16.msra.mxu1 %v3051_v50 }
 0x29f   :  { %v1406_v51 = vpop.f32.mrf.mxu0  ;;  %v1449_v55 = vpop.f32.mrf.mxu1 }
 0x2a0   :  { %v1407_v59 = vadd.f32 %v1406_v51, %v715_v32 }
 0x2a1   :  { %v1408_v52 = vpop.f32.mrf.mxu0  ;;  %v1451_v58 = vpop.f32.mrf.mxu1 }
 0x2a2   :  { %v1409_v57 = vadd.f32 %v1408_v52, %v719_v54  ;;  %v1450_v3 = vadd.f32 %v1449_v55, %v1407_v59 }
 0x2a3   :  { %v1410_v56 = vpop.f32.mrf.mxu0  ;;  %v1453_v63 = vpop.f32.mrf.mxu1 }
 0x2a4   :  { %v1452_v62 = vadd.f32 %v1451_v58, %v1409_v57  ;;  %v1411_v4 = vadd.f32 %v1410_v56, %v715_v32  ;;  %v1552_v10 = vmul.f32 0.1, %v1450_v3  ;;  %vm1544_vm9 = vcmp.gt.f32.partialorder %v1450_v3, 0.0 }
 0x2a5   :  { %v1412_v61 = vpop.f32.mrf.mxu0  ;;  %v1455_v8 = vpop.f32.mrf.mxu1 }
 0x2a6   :  { %v1413_v0 = vadd.f32 %v1412_v61, %v719_v54  ;;  %v1553_v7 = vmul.f32 0.1, %v1452_v62  ;;  %vm1545_vm8 = vcmp.gt.f32.partialorder %v1452_v62, 0.0  ;;  %v1454_v14 = vadd.f32 %v1453_v63, %v1411_v4 }
 0x2a7   :  { %v3548_v25 = vsel %vm1544_vm9, %v1450_v3, %v1552_v10 }
 0x2a8   :  { %v1456_v9 = vadd.f32 %v1455_v8, %v1413_v0  ;;  %v3545_v15 = vsel %vm1545_vm8, %v1452_v62, %v1553_v7  ;;  %v1556_v49 = vmul.f32 0.1, %v1454_v14  ;;  %vm1548_vm11 = vcmp.gt.f32.partialorder %v1454_v14, 0.0 }
 0x2a9   :  { %v1583_v27 = vmul.f32 %v3545_v15, %v3545_v15  ;;  %v1582_v2 = vmul.f32 %v3548_v25, %v3548_v25  ;;  %v1570_v43 = vadd.f32 %v3545_v15, %v3548_v25 }
 0x2aa   :  { %v1557_v21 = vmul.f32 0.1, %v1456_v9  ;;  %vm1549_vm10 = vcmp.gt.f32.partialorder %v1456_v9, 0.0  ;;  %v3556_v40 = vsel %vm1548_vm11, %v1454_v14, %v1556_v49  ;;  %v3054_v14 = vld [vmem:[#allocation5] ss:$8 sps:$4 sm:$0xff]  }
 0x2ab   :  { %v1590_v44 = vadd.f32 %v1583_v27, %v1582_v2  ;;  %v1586_v59 = vmul.f32 %v3556_v40, %v3556_v40  ;;  %v3060_v27 = vld [vmem:[#allocation5 + $0xf0] ss:$8 sps:$4 sm:$0xff]  }
 0x2ac   :  { %v3554_v26 = vsel %vm1549_vm10, %v1456_v9, %v1557_v21  ;;  %v3057_v21 = vld [vmem:[#allocation5 + $0x100] ss:$8 sps:$4 sm:$0xff]   ;;  %v3063_v49 = vld [vmem:[#allocation5 + $0x1f0] ss:$8 sps:$4 sm:$0xff]  }
 0x2ad   :  { %v1587_v47 = vmul.f32 %v3554_v26, %v3554_v26  ;;  %v1575_v54 = vadd.f32 %v3554_v26, %v3556_v40  ;;  %v3072_v2 = vld [vmem:[#allocation5 + $0xd0] ss:$8 sps:$4 sm:$0xff]  }
 0x2af   :  { %v1595_v3 = vadd.f32 %v1587_v47, %v1586_v59  ;;  %v3087_v47 = vld [vmem:[#allocation5 + $0x1b0] ss:$8 sps:$4 sm:$0xff]   ;;  %v3102_v59 = vld [vmem:[#allocation5 + $0x80] ss:$8 sps:$4 sm:$0xff]  }
 0x2df   :  { %v1492_v23 = vpop.f32.mrf.mxu0  ;;  %v1535_v24 = vpop.f32.mrf.mxu1 }
 0x2e0   :  { %v1493_v22 = vadd.f32 %v1492_v23, %v723_v11  ;;  %v3059_v23 = vld [vmem:[#allocation5 + $0x104] ss:$8 sps:$4 sm:$0xff]  }
 0x2e1   :  { %v1494_v41 = vpop.f32.mrf.mxu0  ;;  %v1537_v28 = vpop.f32.mrf.mxu1  ;;  %2149 = vmatprep.subr.bf16.mxu1 %v3059_v23 }
 0x2e2   :  { %v1536_v30 = vadd.f32 %v1535_v24, %v1493_v22  ;;  %v1495_v1 = vadd.f32 %v1494_v41, %v727_v18  ;;  %2150 = vmatpush1.bf16.msra.mxu1 %v3057_v21  ;;  %v3062_v24 = vld [vmem:[#allocation5 + $0xf4] ss:$8 sps:$4 sm:$0xff]   ;;  %v3068_v41 = vld [vmem:[#allocation5 + $0xe4] ss:$8 sps:$4 sm:$0xff]  }
 0x2e3   :  { %v1496_v31 = vpop.f32.mrf.mxu0  ;;  %v1539_v38 = vpop.f32.mrf.mxu1  ;;  %v3065_v22 = vld [vmem:[#allocation5 + $0x1f4] ss:$8 sps:$4 sm:$0xff]  }
 0x2e4   :  { %vm1546_vm12 = vcmp.gt.f32.partialorder %v1536_v30, 0.0  ;;  %v1554_v33 = vmul.f32 0.1, %v1536_v30  ;;  %v1538_v36 = vadd.f32 %v1537_v28, %v1495_v1  ;;  %v1497_v37 = vadd.f32 %v1496_v31, %v723_v11  ;;  %2151 = vmatprep.subr.bf16.mxu1 %v3065_v22  ;;  %v3071_v28 = vld [vmem:[#allocation5 + $0x1e4] ss:$8 sps:$4 sm:$0xff]  }
 0x2e5   :  { %v1498_v42 = vpop.f32.mrf.mxu0  ;;  %v1541_v53 = vpop.f32.mrf.mxu1  ;;  %v3069_v1 = vld [vmem:[#allocation5 + $0x1e0] ss:$8 sps:$4 sm:$0xff]   ;;  %v3074_v31 = vld [vmem:[#allocation5 + $0xd4] ss:$8 sps:$4 sm:$0xff]  }
 0x2e6   :  { %v3560_v35 = vsel %vm1546_vm12, %v1536_v30, %v1554_v33  ;;  %vm1547_vm13 = vcmp.gt.f32.partialorder %v1538_v36, 0.0  ;;  %v1555_v45 = vmul.f32 0.1, %v1538_v36  ;;  %v1540_v46 = vadd.f32 %v1539_v38, %v1497_v37  ;;  %2152 = vmatpush2.bf16.msra.mxu1 %v3063_v49  ;;  %v3066_v30 = vld [vmem:[#allocation5 + $0xe0] ss:$8 sps:$4 sm:$0xff]  }
 0x2e7   :  { %v1499_v60 = vadd.f32 %v1498_v42, %v727_v18  ;;  %v1571_v50 = vadd.f32 %v1570_v43, %v3560_v35  ;;  %v1584_v51 = vmul.f32 %v3560_v35, %v3560_v35  ;;  %v3056_v18 = vld [vmem:[#allocation5 + $0x4] ss:$8 sps:$4 sm:$0xff]   ;;  %2153 = vmatprep.subr.bf16.mxu1 %v3071_v28  ;;  %v3075_v33 = vld [vmem:[#allocation5 + $0x1d0] ss:$8 sps:$4 sm:$0xff]   ;;  %v3078_v42 = vld [vmem:[#allocation5 + $0xc0] ss:$8 sps:$4 sm:$0xff]  }
 0x2e8   :  { %vm1550_vm14 = vcmp.gt.f32.partialorder %v1540_v46, 0.0  ;;  %v1558_v52 = vmul.f32 0.1, %v1540_v46  ;;  %v3567_v55 = vsel %vm1547_vm13, %v1538_v36, %v1555_v45  ;;  %2106 = vmatprep.subr.bf16.mxu0 %v3056_v18  ;;  %v3077_v36 = vld [vmem:[#allocation5 + $0x1d4] ss:$8 sps:$4 sm:$0xff]  }
 0x2e9   :  { %v1542_v32 = vadd.f32 %v1541_v53, %v1499_v60  ;;  %v1572_v56 = vadd.f32 %v1571_v50, %v3567_v55  ;;  %v1585_v57 = vmul.f32 %v3567_v55, %v3567_v55  ;;  %v1591_v58 = vadd.f32 %v1590_v44, %v1584_v51  ;;  %2107 = vmatpush1.bf16.msra.mxu0 %v3054_v14  ;;  %v3080_v37 = vld [vmem:[#allocation5 + $0xc4] ss:$8 sps:$4 sm:$0xff]   ;;  %v3081_v43 = vld [vmem:[#allocation5 + $0x1c0] ss:$8 sps:$4 sm:$0xff]   ;;  %v3086_v44 = vld [vmem:[#allocation5 + $0xb4] ss:$8 sps:$4 sm:$0xff]  }
 0x2ea   :  { %v3576_v61 = vsel %vm1550_vm14, %v1540_v46, %v1558_v52  ;;  %2108 = vmatprep.subr.bf16.mxu0 %v3062_v24  ;;  %2154 = vmatpush2.bf16.msra.mxu1 %v3069_v1  ;;  %v3083_v38 = vld [vmem:[#allocation5 + $0x1c4] ss:$8 sps:$4 sm:$0xff]   ;;  %v3089_v45 = vld [vmem:[#allocation5 + $0x1b4] ss:$8 sps:$4 sm:$0xff]   ;;  %v3084_v46 = vld [vmem:[#allocation5 + $0xb0] ss:$8 sps:$4 sm:$0xff]  }
 0x2eb   :  { %vm1551_vm15 = vcmp.gt.f32.partialorder %v1542_v32, 0.0  ;;  %v1559_v62 = vmul.f32 0.1, %v1542_v32  ;;  %1573 = vadd.xlane.f32.xlu0 %v1572_v56  ;;  %v1576_v63 = vadd.f32 %v1575_v54, %v3576_v61  ;;  %v1588_v0 = vmul.f32 %v3576_v61, %v3576_v61  ;;  %2155 = vmatprep.subr.bf16.mxu1 %v3077_v36  ;;  %v3092_v60 = vld [vmem:[#allocation5 + $0xa4] ss:$8 sps:$4 sm:$0xff]  }
 0x2ec   :  { %v1592_v7 = vadd.f32 %v1591_v58, %v1585_v57  ;;  %v3095_v50 = vld [vmem:[#allocation5 + $0x1a4] ss:$8 sps:$4 sm:$0xff]   ;;  %v3090_v51 = vld [vmem:[#allocation5 + $0xa0] ss:$8 sps:$4 sm:$0xff]   ;;  %v3098_v53 = vld [vmem:[#allocation5 + $0x94] ss:$8 sps:$4 sm:$0xff]  }
 0x2ed   :  { %v3581_v4 = vsel %vm1551_vm15, %v1542_v32, %v1559_v62  ;;  %v1596_v10 = vadd.f32 %v1595_v3, %v1588_v0  ;;  %2109 = vmatpush2.bf16.msra.mxu0 %v3060_v27  ;;  %v3093_v52 = vld [vmem:[#allocation5 + $0x1a0] ss:$8 sps:$4 sm:$0xff]   ;;  %v3101_v54 = vld [vmem:[#allocation5 + $0x194] ss:$8 sps:$4 sm:$0xff]   ;;  %v3096_v32 = vld [vmem:[#allocation5 + $0x90] ss:$8 sps:$4 sm:$0xff]  }
 0x2ee   :  { %v1577_v8 = vadd.f32 %v1576_v63, %v3581_v4  ;;  %v1589_v9 = vmul.f32 %v3581_v4, %v3581_v4  ;;  %2110 = vmatprep.subr.bf16.mxu0 %v3068_v41  ;;  %2156 = vmatpush2.bf16.msra.mxu1 %v3075_v33  ;;  %v3099_v56 = vld [vmem:[#allocation5 + $0x190] ss:$8 sps:$4 sm:$0xff]   ;;  %v3104_v57 = vld [vmem:[#allocation5 + $0x84] ss:$8 sps:$4 sm:$0xff]   ;;  %v3105_v62 = vld [vmem:[#allocation5 + $0x180] ss:$8 sps:$4 sm:$0xff]  }
 0x2ef   :  { %1593 = vadd.xlane.f32.xlu0 %v1592_v7  ;;  %2157 = vmatprep.subr.bf16.mxu1 %v3083_v38  ;;  %v3107_v58 = vld [vmem:[#allocation5 + $0x184] ss:$8 sps:$4 sm:$0xff]   ;;  %v3110_v63 = vld [vmem:[#allocation7 + $0x74] ss:$8 sps:$4 sm:$0xff]   ;;  %v1568_v49 = vld [vmem:[%s3649_s11] sm:$0xf] }
 0x2f0   :  { %1578 = vadd.xlane.f32.xlu1 %v1577_v8  ;;  %v1597_v11 = vadd.f32 %v1596_v10, %v1589_v9  ;;  %v1634_v41 = vrot.slane %v1568_v49, %v3414_v5  ;;  %v1642_v28 = vrot.slane %v1568_v49, %v3436_v20  ;;  %v1638_v1 = vrot.slane %v1568_v49, %v3428_v16 }
 0x2f1   :  { %2111 = vmatpush2.bf16.msra.mxu0 %v3066_v30  ;;  %v1630_v30 = vrot.slane %v1568_v49, %v3416_v6 }
 0x2f2   :  { %2112 = vmatprep.subr.bf16.mxu0 %v3074_v31  ;;  %2158 = vmatpush2.bf16.msra.mxu1 %v3081_v43 }
 0x2f3   :  { %2159 = vmatprep.subr.bf16.mxu1 %v3089_v45 }
 0x2f4   :  { %1598 = vadd.xlane.f32.xlu1 %v1597_v11 }
 0x2f5   :  { %2113 = vmatpush2.bf16.msra.mxu0 %v3072_v2 }
 0x2f6   :  { %2114 = vmatprep.subr.bf16.mxu0 %v3080_v37  ;;  %2160 = vmatpush2.bf16.msra.mxu1 %v3087_v47  ;;  %v1569_v37 = vld [vmem:[%s3650_s12] sm:$0xf] }
 0x2f7   :  { %2161 = vmatprep.subr.bf16.mxu1 %v3095_v50  ;;  %v1671_v47 = vrot.slane %v1569_v37, %v3436_v20 }
 0x2f9   :  { %2115 = vmatpush2.bf16.msra.mxu0 %v3078_v42 }
 0x2fa   :  { %2116 = vmatprep.subr.bf16.mxu0 %v3086_v44  ;;  %2162 = vmatpush2.bf16.msra.mxu1 %v3093_v52 }
 0x2fb   :  { %2163 = vmatprep.subr.bf16.mxu1 %v3101_v54 }
 0x2fd   :  { %2117 = vmatpush2.bf16.msra.mxu0 %v3084_v46  ;;  %v1663_v46 = vrot.slane %v1569_v37, %v3414_v5 }
 0x2fe   :  { %2118 = vmatprep.subr.bf16.mxu0 %v3092_v60  ;;  %2164 = vmatpush2.bf16.msra.mxu1 %v3099_v56 }
 0x2ff   :  { %2165 = vmatprep.subr.bf16.mxu1 %v3107_v58 }
 0x301   :  { %2119 = vmatpush2.bf16.msra.mxu0 %v3090_v51 }
 0x302   :  { %2120 = vmatprep.subr.bf16.mxu0 %v3098_v53  ;;  %2166 = vmatpush2.bf16.msra.mxu1 %v3105_v62 }
 0x305   :  { %2121 = vmatpush2.bf16.msra.mxu0 %v3096_v32 }
 0x306   :  { %2122 = vmatprep.subr.bf16.mxu0 %v3104_v57 }
 0x309   :  { %2123 = vmatpush2.bf16.msra.mxu0 %v3102_v59 }
 0x30a   :  { %2420 = vmatprep.subr.bf16.mxu0 %v3110_v63 }
 0x374   :  { %v1574_v0 = vpop.xlane.xlu0 %1573 }
 0x375   :  { %v1580_v3 = vmul.f32 0.001953125, %v1574_v0 }
 0x377   :  { %v1602_v9 = vmul.f32 %v1580_v3, %v1580_v3  ;;  %v1610_v2 = vsub.f32 %v3548_v25, %v1580_v3  ;;  %v1611_v31 = vsub.f32 %v3545_v15, %v1580_v3  ;;  %v1612_v33 = vsub.f32 %v3560_v35, %v1580_v3 }
 0x378   :  { %v1594_v7 = vpop.xlane.xlu0 %1593  ;;  %v1613_v36 = vsub.f32 %v3567_v55, %v1580_v3  ;;  %v1659_v25 = vrot.slane %v1569_v37, %v3416_v6  ;;  %v1667_v15 = vrot.slane %v1569_v37, %v3428_v16  ;;  %v3134_v37 = vld [vmem:[#allocation7 + $0xf4] ss:$8 sps:$4 sm:$0xff]  }
 0x379   :  { %v1579_v8 = vpop.xlane.xlu1 %1578  ;;  %v1600_v10 = vmul.f32 0.001953125, %v1594_v7 }
 0x37a   :  { %v1581_v11 = vmul.f32 0.001953125, %v1579_v8 }
 0x37b   :  { %v1604_v14 = vsub.f32 %v1600_v10, %v1602_v9 }
 0x37c   :  { %v1603_v23 = vmul.f32 %v1581_v11, %v1581_v11  ;;  %v1614_v51 = vsub.f32 %v3556_v40, %v1581_v11  ;;  %v1615_v52 = vsub.f32 %v3554_v26, %v1581_v11  ;;  %v1616_v53 = vsub.f32 %v3576_v61, %v1581_v11 }
 0x37d   :  { %v1606_v18 = vadd.f32 1e-05, %v1604_v14  ;;  %v1599_v21 = vpop.xlane.xlu1 %1598  ;;  %v1617_v54 = vsub.f32 %v3581_v4, %v1581_v11 }
 0x37e   :  { %v1601_v24 = vmul.f32 0.001953125, %v1599_v21 }
 0x37f   :  { %3160 = vrsqrt.f32 %v1606_v18 }
 0x380   :  { %v1605_v22 = vsub.f32 %v1601_v24, %v1603_v23 }
 0x382   :  { %v1607_v27 = vadd.f32 1e-05, %v1605_v22 }
 0x384   :  { %3162 = vrsqrt.f32 %v1607_v27 }
 0x38c   :  { %v3161_v38 = vpop.eup %3160 }
 0x38d   :  { %v1619_v42 = vmul.f32 %v3161_v38, %v1611_v31  ;;  %v1621_v43 = vmul.f32 %v3161_v38, %v1613_v36  ;;  %v1618_v44 = vmul.f32 %v3161_v38, %v1610_v2  ;;  %v1620_v45 = vmul.f32 %v3161_v38, %v1612_v33  ;;  %v3128_v2 = vld [vmem:[#allocation7 + $0x14] ss:$8 sps:$4 sm:$0xff]   ;;  %v3126_v31 = vld [vmem:[#allocation7 + $0x10] ss:$8 sps:$4 sm:$0xff]   ;;  %v3131_v33 = vld [vmem:[#allocation7 + $0x4] ss:$8 sps:$4 sm:$0xff]  }
 0x38e   :  { %v3129_v36 = vld [vmem:[#allocation7] ss:$8 sps:$4 sm:$0xff]   ;;  %v3132_v38 = vld [vmem:[#allocation7 + $0xf0] ss:$8 sps:$4 sm:$0xff]  }
 0x38f   :  { %v1648_v35 = vmul.f32 %v1634_v41, %v1619_v42  ;;  %v1650_v60 = vmul.f32 %v1642_v28, %v1621_v43  ;;  %v1647_v55 = vmul.f32 %v1630_v30, %v1618_v44  ;;  %v1649_v50 = vmul.f32 %v1638_v1, %v1620_v45  ;;  %v3137_v42 = vld [vmem:[#allocation7 + $0xe4] ss:$8 sps:$4 sm:$0xff]   ;;  %v3135_v43 = vld [vmem:[#allocation7 + $0xe0] ss:$8 sps:$4 sm:$0xff]   ;;  %v3140_v44 = vld [vmem:[#allocation7 + $0xd4] ss:$8 sps:$4 sm:$0xff]  }
 0x390   :  { %v3138_v45 = vld [vmem:[#allocation7 + $0xd0] ss:$8 sps:$4 sm:$0xff]  }
 0x391   :  { %v3163_v32 = vpop.eup %3162  ;;  %v1677_v59 = vadd.f32 %v1663_v46, %v1648_v35  ;;  %v1679_v62 = vadd.f32 %v1671_v47, %v1650_v60  ;;  %v1676_v16 = vadd.f32 %v1659_v25, %v1647_v55  ;;  %v1678_v63 = vadd.f32 %v1667_v15, %v1649_v50  ;;  %v3149_v35 = vld [vmem:[#allocation7 + $0xa4] ss:$8 sps:$4 sm:$0xff]   ;;  %v3147_v60 = vld [vmem:[#allocation7 + $0xa0] ss:$8 sps:$4 sm:$0xff]   ;;  %v3152_v55 = vld [vmem:[#allocation7 + $0x94] ss:$8 sps:$4 sm:$0xff]  }
 0x392   :  { %v1623_v56 = vmul.f32 %v3163_v32, %v1615_v52  ;;  %v1625_v57 = vmul.f32 %v3163_v32, %v1617_v54  ;;  %v1622_v20 = vmul.f32 %v3163_v32, %v1614_v51  ;;  %v1624_v58 = vmul.f32 %v3163_v32, %v1616_v53  ;;  %v3150_v50 = vld [vmem:[#allocation7 + $0x90] ss:$8 sps:$4 sm:$0xff]   ;;  %v3153_v51 = vld [vmem:[#allocation7 + $0x80] ss:$8 sps:$4 sm:$0xff]   ;;  %v3155_v52 = vld [vmem:[#allocation7 + $0x84] ss:$8 sps:$4 sm:$0xff]  }
 0x393   :  { %v1685_v61 = vadd.f32 %v1677_v59, %v3423_v12  ;;  %v1687_v4 = vadd.f32 %v1679_v62, %v3461_v34  ;;  %v1684_v11 = vadd.f32 %v1676_v16, %v3425_v13  ;;  %v1686_v14 = vadd.f32 %v1678_v63, %v3453_v29  ;;  %v3113_v12 = vld [vmem:[#allocation7 + $0x64] ss:$8 sps:$4 sm:$0xff]   ;;  %v3111_v13 = vld [vmem:[#allocation7 + $0x60] ss:$8 sps:$4 sm:$0xff]   ;;  %v3114_v29 = vld [vmem:[#allocation7 + $0x50] ss:$8 sps:$4 sm:$0xff]  }
 0x394   :  { %v1652_v0 = vmul.f32 %v1634_v41, %v1623_v56  ;;  %v1654_v3 = vmul.f32 %v1642_v28, %v1625_v57  ;;  %v1651_v7 = vmul.f32 %v1630_v30, %v1622_v20  ;;  %v1653_v8 = vmul.f32 %v1638_v1, %v1624_v58  ;;  %v3108_v28 = vld [vmem:[#allocation7 + $0x70] ss:$8 sps:$4 sm:$0xff]   ;;  %v3117_v34 = vld [vmem:[#allocation7 + $0x40] ss:$8 sps:$4 sm:$0xff]   ;;  %v3125_v30 = vld [vmem:[#allocation7 + $0x24] ss:$8 sps:$4 sm:$0xff]  }
 0x395   :  { %v3123_v1 = vld [vmem:[#allocation7 + $0x20] ss:$8 sps:$4 sm:$0xff]  }
 0x396   :  { %v1681_v40 = vadd.f32 %v1663_v46, %v1652_v0  ;;  %v1683_v9 = vadd.f32 %v1671_v47, %v1654_v3  ;;  %v1680_v26 = vadd.f32 %v1659_v25, %v1651_v7  ;;  %v1682_v10 = vadd.f32 %v1667_v15, %v1653_v8  ;;  %v3143_v46 = vld [vmem:[#allocation7 + $0xc4] ss:$8 sps:$4 sm:$0xff]   ;;  %v3141_v47 = vld [vmem:[#allocation7 + $0xc0] ss:$8 sps:$4 sm:$0xff]   ;;  %v3146_v25 = vld [vmem:[#allocation7 + $0xb4] ss:$8 sps:$4 sm:$0xff]  }
 0x397   :  { %v3144_v15 = vld [vmem:[#allocation7 + $0xb0] ss:$8 sps:$4 sm:$0xff]   ;;  %v1760_v53 = vld [vmem:[%s3644_s6] sm:$0x3] }
 0x398   :  { %v1689_v18 = vadd.f32 %v1681_v40, %v3434_v19  ;;  %v1691_v21 = vadd.f32 %v1683_v9, %v3484_v48  ;;  %v1688_v23 = vadd.f32 %v1680_v26, %v3430_v17  ;;  %v1690_v24 = vadd.f32 %v1682_v10, %v3469_v39  ;;  %v3116_v19 = vld [vmem:[#allocation7 + $0x54] ss:$8 sps:$4 sm:$0xff]   ;;  %v3119_v17 = vld [vmem:[#allocation7 + $0x44] ss:$8 sps:$4 sm:$0xff]   ;;  %v3120_v48 = vld [vmem:[#allocation7 + $0x30] ss:$8 sps:$4 sm:$0xff]  }
 0x399   :  { %v3122_v39 = vld [vmem:[#allocation7 + $0x34] ss:$8 sps:$4 sm:$0xff]   ;;  %v1765_v54 = vrot.slane %v1760_v53, %v3416_v6  ;;  %v1769_v32 = vrot.slane %v1760_v53, %v3414_v5 }
 0x39a   :  { %v1693_v22 = vpack.c.bf16 %v1689_v18, %v1685_v61  ;;  %v1695_v27 = vpack.c.bf16 %v1691_v21, %v1687_v4  ;;  %v1692_v49 = vpack.c.bf16 %v1688_v23, %v1684_v11  ;;  %v1694_v41 = vpack.c.bf16 %v1690_v24, %v1686_v14 }
 0x39c   :  { %2124 = vmatprep.mubr.bf16.mxu0 %v1693_v22  ;;  %2167 = vmatprep.mubr.bf16.mxu1 %v1695_v27 }
 0x39d   :  { %2125 = vmatmul.mubr.bf16.vlgmr.msra.gmra.mxu0 %v1692_v49  ;;  %2168 = vmatmul.mubr.bf16.vlgmr.msra.gmra.mxu1 %v1694_v41  ;;  %v2238_v49 = vld [vmem:[%s3646_s8] sm:$0x3] }
 0x39e   :  { %2421 = vmatpush1.bf16.msra.mxu0 %v3108_v28  ;;  %v2243_v41 = vrot.slane %v2238_v49, %v3416_v6  ;;  %v2247_v28 = vrot.slane %v2238_v49, %v3414_v5 }
 0x39f   :  { %2422 = vmatprep.subr.bf16.mxu0 %v3113_v12 }
 0x3a2   :  { %2423 = vmatpush1.bf16.msra.mxu0 %v3111_v13 }
 0x3a3   :  { %2424 = vmatprep.subr.bf16.mxu0 %v3116_v19 }
 0x3a6   :  { %2425 = vmatpush1.bf16.msra.mxu0 %v3114_v29 }
 0x3a7   :  { %2426 = vmatprep.subr.bf16.mxu0 %v3119_v17 }
 0x3aa   :  { %2427 = vmatpush1.bf16.msra.mxu0 %v3117_v34 }
 0x3ab   :  { %2428 = vmatprep.subr.bf16.mxu0 %v3122_v39 }
 0x3ae   :  { %2429 = vmatpush1.bf16.msra.mxu0 %v3120_v48 }
 0x3af   :  { %2430 = vmatprep.subr.bf16.mxu0 %v3125_v30 }
 0x3b2   :  { %2431 = vmatpush1.bf16.msra.mxu0 %v3123_v1 }
 0x3b3   :  { %2432 = vmatprep.subr.bf16.mxu0 %v3128_v2 }
 0x3b6   :  { %2433 = vmatpush1.bf16.msra.mxu0 %v3126_v31 }
 0x3b7   :  { %2434 = vmatprep.subr.bf16.mxu0 %v3131_v33 }
 0x3ba   :  { %2435 = vmatpush1.bf16.msra.mxu0 %v3129_v36 }
 0x3bb   :  { %2436 = vmatprep.subr.bf16.mxu0 %v3134_v37 }
 0x3be   :  { %2437 = vmatpush2.bf16.msra.mxu0 %v3132_v38 }
 0x3bf   :  { %2438 = vmatprep.subr.bf16.mxu0 %v3137_v42 }
 0x3c2   :  { %2439 = vmatpush2.bf16.msra.mxu0 %v3135_v43 }
 0x3c3   :  { %2440 = vmatprep.subr.bf16.mxu0 %v3140_v44 }
 0x3c6   :  { %2441 = vmatpush2.bf16.msra.mxu0 %v3138_v45 }
 0x3c7   :  { %2442 = vmatprep.subr.bf16.mxu0 %v3143_v46 }
 0x3ca   :  { %2443 = vmatpush2.bf16.msra.mxu0 %v3141_v47 }
 0x3cb   :  { %2444 = vmatprep.subr.bf16.mxu0 %v3146_v25 }
 0x3ce   :  { %2445 = vmatpush2.bf16.msra.mxu0 %v3144_v15 }
 0x3cf   :  { %2446 = vmatprep.subr.bf16.mxu0 %v3149_v35 }
 0x3d2   :  { %2447 = vmatpush2.bf16.msra.mxu0 %v3147_v60 }
 0x3d3   :  { %2448 = vmatprep.subr.bf16.mxu0 %v3152_v55 }
 0x3d6   :  { %2449 = vmatpush2.bf16.msra.mxu0 %v3150_v50 }
 0x3d7   :  { %2450 = vmatprep.subr.bf16.mxu0 %v3155_v52 }
 0x3da   :  { %2451 = vmatpush2.bf16.msra.mxu0 %v3153_v51 }
 0x45d   :  { %v2126_v56 = vpop.f32.mrf.mxu0  ;;  %v2169_v57 = vpop.f32.mrf.mxu1 }
 0x45e   :  { %v2127_v59 = vadd.f32 %v2126_v56, %v1765_v54 }
 0x45f   :  { %v2128_v20 = vpop.f32.mrf.mxu0  ;;  %v2171_v58 = vpop.f32.mrf.mxu1 }
 0x460   :  { %v2129_v62 = vadd.f32 %v2128_v20, %v1769_v32  ;;  %v2170_v8 = vadd.f32 %v2169_v57, %v2127_v59 }
 0x461   :  { %v2130_v16 = vpop.f32.mrf.mxu0  ;;  %v2173_v0 = vpop.f32.mrf.mxu1 }
 0x462   :  { %v2131_v63 = vadd.f32 %v2130_v16, %v1765_v54  ;;  %v2172_v3 = vadd.f32 %v2171_v58, %v2129_v62  ;;  %v2182_v11 = vmul.f32 0.1, %v2170_v8  ;;  %vm2178_vm2 = vcmp.gt.f32.partialorder %v2170_v8, 0.0 }
 0x463   :  { %v2132_v7 = vpop.f32.mrf.mxu0  ;;  %v2175_v10 = vpop.f32.mrf.mxu1 }
 0x464   :  { %v2174_v40 = vadd.f32 %v2173_v0, %v2131_v63  ;;  %v2133_v9 = vadd.f32 %v2132_v7, %v1769_v32  ;;  %v2183_v61 = vmul.f32 0.1, %v2172_v3  ;;  %vm2179_vm1 = vcmp.gt.f32.partialorder %v2172_v3, 0.0 }
 0x465   :  { %v2186_v24 = vsel %vm2178_vm2, %v2170_v8, %v2182_v11 }
 0x466   :  { %v2184_v26 = vmul.f32 0.1, %v2174_v40  ;;  %vm2180_vm0 = vcmp.gt.f32.partialorder %v2174_v40, 0.0  ;;  %v2176_v4 = vadd.f32 %v2175_v10, %v2133_v9  ;;  %v2187_v21 = vsel %vm2179_vm1, %v2172_v3, %v2183_v61 }
 0x468   :  { %vm2181_vm3 = vcmp.gt.f32.partialorder %v2176_v4, 0.0  ;;  %v2185_v14 = vmul.f32 0.1, %v2176_v4  ;;  %v2188_v18 = vsel %vm2180_vm0, %v2174_v40, %v2184_v26 }
 0x469   :  { %v2761_v27 = vpack.c.bf16 %v2188_v18, %v2186_v24 }
 0x46a   :  { %v2189_v23 = vsel %vm2181_vm3, %v2176_v4, %v2185_v14 }
 0x46b   :  { %v2762_v22 = vpack.c.bf16 %v2189_v23, %v2187_v21 }
 0x46d   :  { %2452 = vmatprep.mubr.bf16.mxu0 %v2762_v22 }
 0x46e   :  { %2453 = vmatmul.mubr.bf16.vlgmr.msra.gmra.mxu0 %v2761_v27 }
 0x52e   :  { %v2454_v12 = vpop.f32.mrf.mxu0 }
 0x52f   :  { %v2455_v13 = vadd.f32 %v2454_v12, %v2243_v41 }
 0x530   :  { %v2456_v19 = vpop.f32.mrf.mxu0 }
 0x531   :  { %2463 = vst [vmem:[%s3651_s13] sm:$0xff] %v2455_v13  ;;  %v2457_v29 = vadd.f32 %v2456_v19, %v2247_v28 }
 0x532   :  { %v2458_v17 = vpop.f32.mrf.mxu0 }
 0x533   :  { %2464 = vst [vmem:[%s3651_s13 + $0x8] sm:$0xff] %v2457_v29  ;;  %v2459_v34 = vadd.f32 %v2458_v17, %v2243_v41 }
 0x534   :  { %v2460_v39 = vpop.f32.mrf.mxu0 }
 0x535   :  { %2465 = vst [vmem:[%s3651_s13 + $0x10] sm:$0xff] %v2459_v34  ;;  %v2461_v5 = vadd.f32 %v2460_v39, %v2247_v28 }
 0x537   :  { %2466 = vst [vmem:[%s3651_s13 + $0x18] sm:$0xff] %v2461_v5 }
 0x538   :  { %2485 = vsyncpa [#allocation4], 1 }
 0x539   :  { %2486 = vsyncpa [#allocation6], 1 }

</bundles_post_ra>
